<compile_context>
chip_gen: v6e
topology: v6e:2x2x1
jax: 0.10.0
libtpu: 0.0.40
codegen_flags: <defaults>
</compile_context>

<pallas_src>
import jax
import jax.numpy as jnp
from jax.experimental import pallas as pl
from jax.experimental.pallas import tpu as pltpu

# Real layer sizes (PyTorch module): 784 -> 256 -> 64 -> 20 -> 64 -> 256 -> 784
_REAL_SHAPES = [(784, 256), (256, 64), (64, 20), (20, 64), (64, 256), (256, 784)]
# Lane-padded sizes (multiples of 128).
_PAD_SHAPES = [(896, 256), (256, 128), (128, 128), (128, 128), (128, 256), (256, 896)]
_D_IN = 896
_D_OUT = 896


def _round_up(x, m):
    return (x + m - 1) // m * m


def _ae_kernel(x_ref,
               w1, b1, w2, b2, w3, b3, w4, b4, w5, b5, w6, b6,
               o_ref):
    def dense(h, w_ref, b_ref):
        # bf16 operands on the MXU, f32 accumulation; bias add stays in f32.
        return jnp.dot(h.astype(jnp.bfloat16), w_ref[...],
                       preferred_element_type=jnp.float32) + b_ref[...]

    h = jnp.maximum(dense(x_ref[...], w1, b1), 0.0)   # 896 -> 256
    h = jnp.maximum(dense(h, w2, b2), 0.0)            # 256 -> 128 (64 real)
    h = jnp.maximum(dense(h, w3, b3), 0.0)            # 128 -> 128 (20 real)
    h = jnp.maximum(dense(h, w4, b4), 0.0)            # 128 -> 128 (64 real)
    h = jnp.maximum(dense(h, w5, b5), 0.0)            # 128 -> 256
    o_ref[...] = jax.nn.sigmoid(dense(h, w6, b6))     # 256 -> 896 (784 real)


def init_params(key):
    """torch.nn.Linear-style init: U(-1/sqrt(fan_in), 1/sqrt(fan_in)), f32, real shapes."""
    params = []
    for i, (fan_in, fan_out) in enumerate(_REAL_SHAPES):
        kw, kb = jax.random.split(jax.random.fold_in(key, i))
        bound = 1.0 / jnp.sqrt(fan_in)
        w = jax.random.uniform(kw, (fan_in, fan_out), jnp.float32, -bound, bound)
        b = jax.random.uniform(kb, (1, fan_out), jnp.float32, -bound, bound)
        params.append((w, b))
    return params


def prepare_params(params):
    """Pad weights to lane-aligned shapes (zeros) and cast weights to bf16.

    Done once, outside the kernel call.  Biases stay f32 (bias add is f32).
    """
    prepared = []
    for (w, b), (ip, op) in zip(params, _PAD_SHAPES):
        fi, fo = w.shape
        wp = jnp.zeros((ip, op), jnp.float32).at[:fi, :fo].set(w).astype(jnp.bfloat16)
        bp = jnp.zeros((1, op), jnp.float32).at[:, :fo].set(b.reshape(1, fo))
        prepared.append((wp, bp))
    return prepared


def ae_forward(x, prepared_params):
    """x: (B, 1, 28, 28) f32 -> (out (B, 1, 28, 28) f32, None)."""
    B = x.shape[0]
    x_flat = x.reshape(B, 784)

    # Batch tile: large enough for lane/sublane-dense blocks and good HBM BW,
    # small enough to stay well inside the default scoped VMEM limit.
    TB = min(512, _round_up(max(B, 1), 8))
    B_pad = _round_up(B, TB)

    # Pad batch to a grid multiple and lanes 784 -> 896; cast input to bf16
    # (halves input DMA; the matmul operands are bf16 anyway).
    x_pad = jnp.pad(x_flat.astype(jnp.bfloat16),
                    ((0, B_pad - B), (0, _D_IN - 784)))

    flat_params = []
    for w, b in prepared_params:
        flat_params.extend([w, b])

    # Weight/bias specs: full array, constant index_map -> VMEM-resident.
    param_specs = [pl.BlockSpec(p.shape, lambda i: (0, 0)) for p in flat_params]

    # Advisory cost estimate (padded sizes).
    mac = sum(ip * op for ip, op in _PAD_SHAPES)
    param_bytes = sum(int(p.size) * p.dtype.itemsize for p in flat_params)
    cost = pl.CostEstimate(
        flops=2 * B_pad * mac,
        transcendentals=B_pad * _D_OUT,
        bytes_accessed=B_pad * _D_IN * 2 + B_pad * _D_OUT * 4 + param_bytes,
    )

    out_pad = pl.pallas_call(
        _ae_kernel,
        out_shape=jax.ShapeDtypeStruct((B_pad, _D_OUT), jnp.float32),
        grid=(B_pad // TB,),
        in_specs=[pl.BlockSpec((TB, _D_IN), lambda i: (i, 0))] + param_specs,
        out_specs=pl.BlockSpec((TB, _D_OUT), lambda i: (i, 0)),
        compiler_params=pltpu.CompilerParams(
            dimension_semantics=("parallel",)),
        cost_estimate=cost,
    )(x_pad, *flat_params)

    out = out_pad[:B, :784].reshape(B, 1, 28, 28)
    return out, None


def ae_ref(x, params):
    """Pure-JAX f32 reference (unpadded weights) for correctness check."""
    h = x.reshape(x.shape[0], 784)
    for i, (w, b) in enumerate(params):
        h = h @ w + b
        h = jax.nn.sigmoid(h) if i == len(params) - 1 else jnp.maximum(h, 0.0)
    return h.reshape(x.shape[0], 1, 28, 28)


if __name__ == "__main__":
    key = jax.random.PRNGKey(0)
    k_x, k_p = jax.random.split(key)

    batch = 2
    x = jax.random.uniform(k_x, (batch, 1, 28, 28), jnp.float32)
    params = init_params(k_p)
    prepared = prepare_params(params)

    out, aux = ae_forward(x, prepared)
    out = jax.block_until_ready(out)

    assert out.shape == (batch, 1, 28, 28)
    assert aux is None

    ref = ae_ref(x, params)
    # bf16 MXU operands with f32 accumulation -> loosened tolerance vs f32 ref.
    assert jnp.allclose(out, ref, atol=2e-2), "mismatch vs reference"

    print("KERNEL_OK")
</pallas_src>

<mosaic_0001>
module attributes {stable_mosaic.version = 11 : i64} {
  func.func @_ae_kernel(%arg0: i32, %arg1: memref<8x896xbf16, #tpu.memory_space<vmem>>, %arg2: memref<896x256xbf16, #tpu.memory_space<vmem>>, %arg3: memref<1x256xf32, #tpu.memory_space<vmem>>, %arg4: memref<256x128xbf16, #tpu.memory_space<vmem>>, %arg5: memref<1x128xf32, #tpu.memory_space<vmem>>, %arg6: memref<128x128xbf16, #tpu.memory_space<vmem>>, %arg7: memref<1x128xf32, #tpu.memory_space<vmem>>, %arg8: memref<128x128xbf16, #tpu.memory_space<vmem>>, %arg9: memref<1x128xf32, #tpu.memory_space<vmem>>, %arg10: memref<128x256xbf16, #tpu.memory_space<vmem>>, %arg11: memref<1x256xf32, #tpu.memory_space<vmem>>, %arg12: memref<256x896xbf16, #tpu.memory_space<vmem>>, %arg13: memref<1x896xf32, #tpu.memory_space<vmem>>, %arg14: memref<8x896xf32, #tpu.memory_space<vmem>>) attributes {dimension_semantics = [#tpu.dimension_semantics<parallel>], iteration_bounds = array<i64: 1>, scalar_prefetch = 0 : i64, scratch_operands = 0 : i64, tpu.core_type = #tpu.core_type<tc>, window_params = [{transform_indices = @transform_0, window_bounds = array<i64: 8, 896>}, {pipeline_mode = #tpu.pipeline_mode<synchronous>, transform_indices = @transform_1, window_bounds = array<i64: 896, 256>}, {pipeline_mode = #tpu.pipeline_mode<synchronous>, transform_indices = @transform_2, window_bounds = array<i64: 1, 256>}, {pipeline_mode = #tpu.pipeline_mode<synchronous>, transform_indices = @transform_3, window_bounds = array<i64: 256, 128>}, {pipeline_mode = #tpu.pipeline_mode<synchronous>, transform_indices = @transform_4, window_bounds = array<i64: 1, 128>}, {pipeline_mode = #tpu.pipeline_mode<synchronous>, transform_indices = @transform_5, window_bounds = array<i64: 128, 128>}, {pipeline_mode = #tpu.pipeline_mode<synchronous>, transform_indices = @transform_6, window_bounds = array<i64: 1, 128>}, {pipeline_mode = #tpu.pipeline_mode<synchronous>, transform_indices = @transform_7, window_bounds = array<i64: 128, 128>}, {pipeline_mode = #tpu.pipeline_mode<synchronous>, transform_indices = @transform_8, window_bounds = array<i64: 1, 128>}, {pipeline_mode = #tpu.pipeline_mode<synchronous>, transform_indices = @transform_9, window_bounds = array<i64: 128, 256>}, {pipeline_mode = #tpu.pipeline_mode<synchronous>, transform_indices = @transform_10, window_bounds = array<i64: 1, 256>}, {pipeline_mode = #tpu.pipeline_mode<synchronous>, transform_indices = @transform_11, window_bounds = array<i64: 256, 896>}, {pipeline_mode = #tpu.pipeline_mode<synchronous>, transform_indices = @transform_12, window_bounds = array<i64: 1, 896>}, {transform_indices = @transform_13, window_bounds = array<i64: 8, 896>}]} {
    %c0 = arith.constant 0 : index
    %c0_0 = arith.constant 0 : index
    %0 = vector.load %arg1[%c0, %c0_0] : memref<8x896xbf16, #tpu.memory_space<vmem>>, vector<8x896xbf16>
    %c0_1 = arith.constant 0 : index
    %c0_2 = arith.constant 0 : index
    %1 = vector.load %arg2[%c0_1, %c0_2] : memref<896x256xbf16, #tpu.memory_space<vmem>>, vector<896x256xbf16>
    %cst = arith.constant dense<0.000000e+00> : vector<8x256xf32>
    %2 = tpu.matmul %0, %1, %cst {dimension_numbers = #tpu.dot_dimension_numbers<[1], [0], [0], [1], [0, 0, 1, 1], [], []>} : vector<8x896xbf16>, vector<896x256xbf16>, vector<8x256xf32> -> vector<8x256xf32>
    %c0_3 = arith.constant 0 : index
    %c0_4 = arith.constant 0 : index
    %3 = vector.load %arg3[%c0_3, %c0_4] : memref<1x256xf32, #tpu.memory_space<vmem>>, vector<1x256xf32>
    %4 = vector.broadcast %3 : vector<1x256xf32> to vector<8x256xf32>
    %5 = arith.addf %2, %4 : vector<8x256xf32>
    %cst_5 = arith.constant 0.000000e+00 : f32
    %6 = vector.broadcast %cst_5 : f32 to vector<8x256xf32>
    %7 = arith.maximumf %5, %6 : vector<8x256xf32>
    %8 = arith.truncf %7 : vector<8x256xf32> to vector<8x256xbf16>
    %c0_6 = arith.constant 0 : index
    %c0_7 = arith.constant 0 : index
    %9 = vector.load %arg4[%c0_6, %c0_7] : memref<256x128xbf16, #tpu.memory_space<vmem>>, vector<256x128xbf16>
    %cst_8 = arith.constant dense<0.000000e+00> : vector<8x128xf32>
    %10 = tpu.matmul %8, %9, %cst_8 {dimension_numbers = #tpu.dot_dimension_numbers<[1], [0], [0], [1], [0, 0, 1, 1], [], []>} : vector<8x256xbf16>, vector<256x128xbf16>, vector<8x128xf32> -> vector<8x128xf32>
    %c0_9 = arith.constant 0 : index
    %c0_10 = arith.constant 0 : index
    %11 = vector.load %arg5[%c0_9, %c0_10] : memref<1x128xf32, #tpu.memory_space<vmem>>, vector<1x128xf32>
    %12 = vector.broadcast %11 : vector<1x128xf32> to vector<8x128xf32>
    %13 = arith.addf %10, %12 : vector<8x128xf32>
    %cst_11 = arith.constant 0.000000e+00 : f32
    %14 = vector.broadcast %cst_11 : f32 to vector<8x128xf32>
    %15 = arith.maximumf %13, %14 : vector<8x128xf32>
    %16 = arith.truncf %15 : vector<8x128xf32> to vector<8x128xbf16>
    %c0_12 = arith.constant 0 : index
    %c0_13 = arith.constant 0 : index
    %17 = vector.load %arg6[%c0_12, %c0_13] : memref<128x128xbf16, #tpu.memory_space<vmem>>, vector<128x128xbf16>
    %cst_14 = arith.constant dense<0.000000e+00> : vector<8x128xf32>
    %18 = tpu.matmul %16, %17, %cst_14 {dimension_numbers = #tpu.dot_dimension_numbers<[1], [0], [0], [1], [0, 0, 1, 1], [], []>} : vector<8x128xbf16>, vector<128x128xbf16>, vector<8x128xf32> -> vector<8x128xf32>
    %c0_15 = arith.constant 0 : index
    %c0_16 = arith.constant 0 : index
    %19 = vector.load %arg7[%c0_15, %c0_16] : memref<1x128xf32, #tpu.memory_space<vmem>>, vector<1x128xf32>
    %20 = vector.broadcast %19 : vector<1x128xf32> to vector<8x128xf32>
    %21 = arith.addf %18, %20 : vector<8x128xf32>
    %cst_17 = arith.constant 0.000000e+00 : f32
    %22 = vector.broadcast %cst_17 : f32 to vector<8x128xf32>
    %23 = arith.maximumf %21, %22 : vector<8x128xf32>
    %24 = arith.truncf %23 : vector<8x128xf32> to vector<8x128xbf16>
    %c0_18 = arith.constant 0 : index
    %c0_19 = arith.constant 0 : index
    %25 = vector.load %arg8[%c0_18, %c0_19] : memref<128x128xbf16, #tpu.memory_space<vmem>>, vector<128x128xbf16>
    %cst_20 = arith.constant dense<0.000000e+00> : vector<8x128xf32>
    %26 = tpu.matmul %24, %25, %cst_20 {dimension_numbers = #tpu.dot_dimension_numbers<[1], [0], [0], [1], [0, 0, 1, 1], [], []>} : vector<8x128xbf16>, vector<128x128xbf16>, vector<8x128xf32> -> vector<8x128xf32>
    %c0_21 = arith.constant 0 : index
    %c0_22 = arith.constant 0 : index
    %27 = vector.load %arg9[%c0_21, %c0_22] : memref<1x128xf32, #tpu.memory_space<vmem>>, vector<1x128xf32>
    %28 = vector.broadcast %27 : vector<1x128xf32> to vector<8x128xf32>
    %29 = arith.addf %26, %28 : vector<8x128xf32>
    %cst_23 = arith.constant 0.000000e+00 : f32
    %30 = vector.broadcast %cst_23 : f32 to vector<8x128xf32>
    %31 = arith.maximumf %29, %30 : vector<8x128xf32>
    %32 = arith.truncf %31 : vector<8x128xf32> to vector<8x128xbf16>
    %c0_24 = arith.constant 0 : index
    %c0_25 = arith.constant 0 : index
    %33 = vector.load %arg10[%c0_24, %c0_25] : memref<128x256xbf16, #tpu.memory_space<vmem>>, vector<128x256xbf16>
    %cst_26 = arith.constant dense<0.000000e+00> : vector<8x256xf32>
    %34 = tpu.matmul %32, %33, %cst_26 {dimension_numbers = #tpu.dot_dimension_numbers<[1], [0], [0], [1], [0, 0, 1, 1], [], []>} : vector<8x128xbf16>, vector<128x256xbf16>, vector<8x256xf32> -> vector<8x256xf32>
    %c0_27 = arith.constant 0 : index
    %c0_28 = arith.constant 0 : index
    %35 = vector.load %arg11[%c0_27, %c0_28] : memref<1x256xf32, #tpu.memory_space<vmem>>, vector<1x256xf32>
    %36 = vector.broadcast %35 : vector<1x256xf32> to vector<8x256xf32>
    %37 = arith.addf %34, %36 : vector<8x256xf32>
    %cst_29 = arith.constant 0.000000e+00 : f32
    %38 = vector.broadcast %cst_29 : f32 to vector<8x256xf32>
    %39 = arith.maximumf %37, %38 : vector<8x256xf32>
    %40 = arith.truncf %39 : vector<8x256xf32> to vector<8x256xbf16>
    %c0_30 = arith.constant 0 : index
    %c0_31 = arith.constant 0 : index
    %41 = vector.load %arg12[%c0_30, %c0_31] : memref<256x896xbf16, #tpu.memory_space<vmem>>, vector<256x896xbf16>
    %cst_32 = arith.constant dense<0.000000e+00> : vector<8x896xf32>
    %42 = tpu.matmul %40, %41, %cst_32 {dimension_numbers = #tpu.dot_dimension_numbers<[1], [0], [0], [1], [0, 0, 1, 1], [], []>} : vector<8x256xbf16>, vector<256x896xbf16>, vector<8x896xf32> -> vector<8x896xf32>
    %c0_33 = arith.constant 0 : index
    %c0_34 = arith.constant 0 : index
    %43 = vector.load %arg13[%c0_33, %c0_34] : memref<1x896xf32, #tpu.memory_space<vmem>>, vector<1x896xf32>
    %44 = vector.broadcast %43 : vector<1x896xf32> to vector<8x896xf32>
    %45 = arith.addf %42, %44 : vector<8x896xf32>
    %46 = arith.negf %45 : vector<8x896xf32>
    %47 = math.exp %46 : vector<8x896xf32>
    %cst_35 = arith.constant 1.000000e+00 : f32
    %48 = vector.broadcast %cst_35 : f32 to vector<8x896xf32>
    %49 = arith.addf %48, %47 : vector<8x896xf32>
    %50 = arith.divf %48, %49 : vector<8x896xf32>
    %c0_36 = arith.constant 0 : index
    %c0_37 = arith.constant 0 : index
    %51 = vector.load %arg14[%c0_36, %c0_37] : memref<8x896xf32, #tpu.memory_space<vmem>>, vector<8x896xf32>
    tpu.vector_store %arg14[%c0_36, %c0_37], %50 {strides = array<i32>} : memref<8x896xf32, #tpu.memory_space<vmem>>, vector<8x896xf32>,
    return
  }
  func.func @transform_0(%arg0: i32) -> (i32, i32) {
    %c0_i32 = arith.constant 0 : i32
    %c0_i32_0 = arith.constant 0 : i32
    return %arg0, %c0_i32 : i32, i32
  }
  func.func @transform_1(%arg0: i32) -> (i32, i32) {
    %c0_i32 = arith.constant 0 : i32
    %c0_i32_0 = arith.constant 0 : i32
    %c0_i32_1 = arith.constant 0 : i32
    return %c0_i32, %c0_i32_0 : i32, i32
  }
  func.func @transform_2(%arg0: i32) -> (i32, i32) {
    %c0_i32 = arith.constant 0 : i32
    %c0_i32_0 = arith.constant 0 : i32
    %c0_i32_1 = arith.constant 0 : i32
    return %c0_i32, %c0_i32_0 : i32, i32
  }
  func.func @transform_3(%arg0: i32) -> (i32, i32) {
    %c0_i32 = arith.constant 0 : i32
    %c0_i32_0 = arith.constant 0 : i32
    %c0_i32_1 = arith.constant 0 : i32
    return %c0_i32, %c0_i32_0 : i32, i32
  }
  func.func @transform_4(%arg0: i32) -> (i32, i32) {
    %c0_i32 = arith.constant 0 : i32
    %c0_i32_0 = arith.constant 0 : i32
    %c0_i32_1 = arith.constant 0 : i32
    return %c0_i32, %c0_i32_0 : i32, i32
  }
  func.func @transform_5(%arg0: i32) -> (i32, i32) {
    %c0_i32 = arith.constant 0 : i32
    %c0_i32_0 = arith.constant 0 : i32
    %c0_i32_1 = arith.constant 0 : i32
    return %c0_i32, %c0_i32_0 : i32, i32
  }
  func.func @transform_6(%arg0: i32) -> (i32, i32) {
    %c0_i32 = arith.constant 0 : i32
    %c0_i32_0 = arith.constant 0 : i32
    %c0_i32_1 = arith.constant 0 : i32
    return %c0_i32, %c0_i32_0 : i32, i32
  }
  func.func @transform_7(%arg0: i32) -> (i32, i32) {
    %c0_i32 = arith.constant 0 : i32
    %c0_i32_0 = arith.constant 0 : i32
    %c0_i32_1 = arith.constant 0 : i32
    return %c0_i32, %c0_i32_0 : i32, i32
  }
  func.func @transform_8(%arg0: i32) -> (i32, i32) {
    %c0_i32 = arith.constant 0 : i32
    %c0_i32_0 = arith.constant 0 : i32
    %c0_i32_1 = arith.constant 0 : i32
    return %c0_i32, %c0_i32_0 : i32, i32
  }
  func.func @transform_9(%arg0: i32) -> (i32, i32) {
    %c0_i32 = arith.constant 0 : i32
    %c0_i32_0 = arith.constant 0 : i32
    %c0_i32_1 = arith.constant 0 : i32
    return %c0_i32, %c0_i32_0 : i32, i32
  }
  func.func @transform_10(%arg0: i32) -> (i32, i32) {
    %c0_i32 = arith.constant 0 : i32
    %c0_i32_0 = arith.constant 0 : i32
    %c0_i32_1 = arith.constant 0 : i32
    return %c0_i32, %c0_i32_0 : i32, i32
  }
  func.func @transform_11(%arg0: i32) -> (i32, i32) {
    %c0_i32 = arith.constant 0 : i32
    %c0_i32_0 = arith.constant 0 : i32
    %c0_i32_1 = arith.constant 0 : i32
    return %c0_i32, %c0_i32_0 : i32, i32
  }
  func.func @transform_12(%arg0: i32) -> (i32, i32) {
    %c0_i32 = arith.constant 0 : i32
    %c0_i32_0 = arith.constant 0 : i32
    %c0_i32_1 = arith.constant 0 : i32
    return %c0_i32, %c0_i32_0 : i32, i32
  }
  func.func @transform_13(%arg0: i32) -> (i32, i32) {
    %c0_i32 = arith.constant 0 : i32
    %c0_i32_0 = arith.constant 0 : i32
    return %arg0, %c0_i32 : i32, i32
  }
}

</mosaic_0001>

<bundles_post_ra>
// kernel: tpu_custom_call.1
= control target key start
LH: loop header
LB: loop body
LE: loop exit
PB: predicated region body
PF: predicated region fallthrough
CT: control target
= control target key end

     0   :  { %18 = vsyncpa [#allocation3], 0  ;;  %s3733_s0 = inlined_call_operand.hbm [shape: bf16[8,896], index: 0, kind: input, shape index: {}]   ;;  %s3734_s1 = inlined_call_operand.hbm [shape: bf16[896,256], index: 1, kind: input, shape index: {}]   ;;  %s3735_s2 = inlined_call_operand.vmem [shape: f32[1,256], index: 2, kind: input, shape index: {}]   ;;  %s3736_s3 = inlined_call_operand.hbm [shape: bf16[256,128], index: 3, kind: input, shape index: {}]   ;;  %s3737_s4 = inlined_call_operand.vmem [shape: f32[1,128], index: 4, kind: input, shape index: {}]   ;;  %s3738_s5 = inlined_call_operand.hbm [shape: bf16[128,128], index: 5, kind: input, shape index: {}]   ;;  %s3739_s6 = inlined_call_operand.vmem [shape: f32[1,128], index: 6, kind: input, shape index: {}]   ;;  %s3740_s7 = inlined_call_operand.hbm [shape: bf16[128,128], index: 7, kind: input, shape index: {}]   ;;  %s3741_s8 = inlined_call_operand.vmem [shape: f32[1,128], index: 8, kind: input, shape index: {}]   ;;  %s3742_s9 = inlined_call_operand.hbm [shape: bf16[128,256], index: 9, kind: input, shape index: {}]   ;;  %s3743_s10 = inlined_call_operand.vmem [shape: f32[1,256], index: 10, kind: input, shape index: {}]   ;;  %s3744_s11 = inlined_call_operand.hbm [shape: bf16[256,896], index: 11, kind: input, shape index: {}]   ;;  %s3745_s12 = inlined_call_operand.vmem [shape: f32[1,896], index: 12, kind: input, shape index: {}]   ;;  %s3746_s13 = inlined_call_operand.hbm [shape: f32[8,896], index: 13, kind: output, shape index: {}]  }
   0x1   :  { %19 = vsyncpa [#allocation6], 0 }
   0x2   :  { %20 = vsyncpa [#allocation9], 0 }
   0x3   :  { %21 = vsyncpa [#allocation12], 0 }
   0x4   :  { %22 = vsyncpa [#allocation4], 0  ;;  %s3544_s25 = smov [#allocation5]  }
   0x5   :  { %s38_s26 = sshll.u32 %s3544_s25, 4  ;;  %s39_s26 = int_to_ptr.vmem [resolvable:$true] %s38_s26 }
   0x6   :  { %s3382_s27 = scalar_lea.vmem %s39_s26, 14336  ;;  %p3387_p1 = scmp.lt.s32.totalorder %s39_s26, %s39_s26 }
   0x7   :  { %p3383_p0 = scmp.ne.s32.totalorder %s39_s26, %s3382_s27  ;;  %p3388_p2 = scmp.lt.s32.totalorder %s3382_s27, %s3382_s27 }
   0x9   :  { %p3389_p3 = por %p3388_p2, %p3387_p1 }
   0xb   :  { %p3390_p4 = pnand %p3389_p3, %p3383_p0 }
   0xd   :  { %3393 = shalt.err (!%p3390_p4)
}
   0xe   :  { %s3545_s28 = smov 128   ;;  %s3546_s29 = smov 8  }
   0xf   :  { %44 = dma.hbm_to_vmem [thread:$0]  %s3734_s1, 14336, %s39_s26, [#allocation6], %s3545_s28, %s3545_s28, %s3546_s29  }
  0x10   :  { %s3547_s15 = smov [#allocation8]   ;;  %s3548_s17 = smov [#allocation11]  }
  0x11   :  { %s66_s16 = sshll.u32 %s3547_s15, 4  ;;  %s94_s18 = sshll.u32 %s3548_s17, 4  ;;  %s67_s16 = int_to_ptr.vmem [resolvable:$true] %s66_s16  ;;  %s95_s18 = int_to_ptr.vmem [resolvable:$true] %s94_s18 }
  0x12   :  { %s3402_s19 = scalar_lea.vmem %s67_s16, 1024  ;;  %p3407_p6 = scmp.lt.s32.totalorder %s67_s16, %s67_s16 }
  0x13   :  { %p3403_p5 = scmp.ne.s32.totalorder %s67_s16, %s3402_s19  ;;  %p3408_p7 = scmp.lt.s32.totalorder %s3402_s19, %s3402_s19 }
  0x15   :  { %p3409_p8 = por %p3408_p7, %p3407_p6 }
  0x17   :  { %p3410_p9 = pnand %p3409_p8, %p3403_p5 }
  0x19   :  { %3413 = shalt.err (!%p3410_p9)
}
  0x1a   :  { %s3549_s20 = smov 64   ;;  %s3550_s21 = smov 4  }
  0x1b   :  { %72 = dma.hbm_to_vmem [thread:$0]  %s3738_s5, 1024, %s67_s16, [#allocation9], %s3549_s20, %s3549_s20, %s3550_s21  }
  0x1c   :  { %s3422_s1 = scalar_lea.vmem %s95_s18, 2048  ;;  %p3427_p11 = scmp.lt.s32.totalorder %s95_s18, %s95_s18 }
  0x1d   :  { %p3423_p10 = scmp.ne.s32.totalorder %s95_s18, %s3422_s1  ;;  %p3428_p12 = scmp.lt.s32.totalorder %s3422_s1, %s3422_s1 }
  0x1f   :  { %p3429_p13 = por %p3428_p12, %p3427_p11 }
  0x21   :  { %p3430_p0 = pnand %p3429_p13, %p3423_p10 }
  0x23   :  { %3433 = shalt.err (!%p3430_p0)
}
  0x24   :  { %100 = dma.hbm_to_vmem [thread:$0]  %s3742_s9, 2048, %s95_s18, [#allocation12], %s3545_s28, %s3545_s28, %s3546_s29  }
  0x25   :  { %s3551_s26 = smov [#allocation2]   ;;  %s3552_s30 = smov [#allocation7]  }
  0x26   :  { %s29_s27 = sshll.u32 %s3551_s26, 4  ;;  %s52_s14 = sshll.u32 %s3552_s30, 4  ;;  %s30_s27 = int_to_ptr.vmem [resolvable:$true] %s29_s27  ;;  %s53_s14 = int_to_ptr.vmem [resolvable:$true] %s52_s14 }
  0x27   :  { %s3442_s15 = scalar_lea.vmem %s30_s27, 448  ;;  %p3447_p2 = scmp.lt.s32.totalorder %s30_s27, %s30_s27 }
  0x28   :  { %p3443_p1 = scmp.ne.s32.totalorder %s30_s27, %s3442_s15  ;;  %p3448_p3 = scmp.lt.s32.totalorder %s3442_s15, %s3442_s15 }
  0x2a   :  { %p3449_p4 = por %p3448_p3, %p3447_p2 }
  0x2c   :  { %p3450_p5 = pnand %p3449_p4, %p3443_p1 }
  0x2e   :  { %3453 = shalt.err (!%p3450_p5)
}
  0x2f   :  { %32 = dma.hbm_to_vmem [thread:$0]  %s3733_s0, 448, %s30_s27, [#allocation3]  }
  0x30   :  { %s3462_s17 = scalar_lea.vmem %s53_s14, 2048  ;;  %p3467_p7 = scmp.lt.s32.totalorder %s53_s14, %s53_s14 }
  0x31   :  { %p3463_p6 = scmp.ne.s32.totalorder %s53_s14, %s3462_s17  ;;  %p3468_p8 = scmp.lt.s32.totalorder %s3462_s17, %s3462_s17 }
  0x33   :  { %p3469_p9 = por %p3468_p8, %p3467_p7 }
  0x35   :  { %p3470_p10 = pnand %p3469_p9, %p3463_p6 }
  0x37   :  { %3473 = shalt.err (!%p3470_p10)
}
  0x38   :  { %58 = dma.hbm_to_vmem [thread:$0]  %s3736_s3, 2048, %s53_s14, [#allocation6], %s3549_s20, %s3549_s20, %s3550_s21  }
  0x39   :  { %s3553_s29 = smov [#allocation10]   ;;  %s3554_s19 = smov [#allocation13]  }
  0x3a   :  { %s80_s18 = sshll.u32 %s3553_s29, 4  ;;  %s108_s0 = sshll.u32 %s3554_s19, 4  ;;  %s81_s18 = int_to_ptr.vmem [resolvable:$true] %s80_s18  ;;  %s109_s0 = int_to_ptr.vmem [resolvable:$true] %s108_s0 }
  0x3b   :  { %s3482_s22 = scalar_lea.vmem %s81_s18, 1024  ;;  %p3487_p12 = scmp.lt.s32.totalorder %s81_s18, %s81_s18 }
  0x3c   :  { %p3483_p11 = scmp.ne.s32.totalorder %s81_s18, %s3482_s22  ;;  %p3488_p13 = scmp.lt.s32.totalorder %s3482_s22, %s3482_s22 }
  0x3e   :  { %p3489_p0 = por %p3488_p13, %p3487_p12 }
  0x40   :  { %p3490_p1 = pnand %p3489_p0, %p3483_p11 }
  0x42   :  { %3493 = shalt.err (!%p3490_p1)
}
  0x43   :  { %86 = dma.hbm_to_vmem [thread:$0]  %s3740_s7, 1024, %s81_s18, [#allocation9], %s3549_s20, %s3549_s20, %s3550_s21  }
  0x44   :  { %s3502_s3 = scalar_lea.vmem %s109_s0, 14336  ;;  %p3507_p3 = scmp.lt.s32.totalorder %s109_s0, %s109_s0 }
  0x45   :  { %p3503_p2 = scmp.ne.s32.totalorder %s109_s0, %s3502_s3  ;;  %p3508_p4 = scmp.lt.s32.totalorder %s3502_s3, %s3502_s3 }
  0x47   :  { %p3509_p5 = por %p3508_p4, %p3507_p3 }
  0x49   :  { %p3510_p6 = pnand %p3509_p5, %p3503_p2 }
  0x4b   :  { %3513 = shalt.err (!%p3510_p6)
}
  0x4c   :  { %s3555_s24 = smov 448   ;;  %s3556_s25 = smov 28  }
  0x4d   :  { %114 = dma.hbm_to_vmem [thread:$0]  %s3744_s11, 14336, %s109_s0, [#allocation12], %s3555_s24, %s3555_s24, %s3556_s25  }
  0x4e   :  { %3534 = dma.done.wait [#allocation3], 448  }
  0x4f   :  { %3535 = vsyncadd [#allocation3], 4294966848 }
  0x50   :  { %3536 = dma.done.wait [#allocation6], 16384  }
  0x51   :  { %3537 = vsyncadd [#allocation6], 4294950912 }
  0x52   :  { %3538 = dma.done.wait [#allocation9], 2048  }
  0x53   :  { %3539 = vsyncadd [#allocation9], 4294965248 }
  0x54   :  { %3540 = dma.done.wait [#allocation12], 16384  }
  0x55   :  { %3541 = vsyncadd [#allocation12], 4294950912  ;;  %v2955_v0 = vld [vmem:[#allocation5 + $0x74] ss:$8 sps:$4 sm:$0xff]   ;;  %v2957_v1 = vld [vmem:[#allocation5 + $0x70] ss:$8 sps:$4 sm:$0xff]  }
  0x56   :  { %852 = vmatprep.subr.bf16.mxu0 %v2955_v0  ;;  %v2958_v2 = vld [vmem:[#allocation5 + $0x174] ss:$8 sps:$4 sm:$0xff]   ;;  %v2960_v3 = vld [vmem:[#allocation5 + $0x170] ss:$8 sps:$4 sm:$0xff]   ;;  %v2961_v4 = vld [vmem:[#allocation5 + $0x64] ss:$8 sps:$4 sm:$0xff]  }
  0x57   :  { %853 = vmatpush1.bf16.msra.mxu0 %v2957_v1  ;;  %v2963_v5 = vld [vmem:[#allocation5 + $0x60] ss:$8 sps:$4 sm:$0xff]   ;;  %893 = vmatprep.subr.bf16.mxu1 %v2958_v2  ;;  %v2964_v6 = vld [vmem:[#allocation5 + $0x164] ss:$8 sps:$4 sm:$0xff]   ;;  %v2967_v8 = vld [vmem:[#allocation5 + $0x54] ss:$8 sps:$4 sm:$0xff]  }
  0x58   :  { %894 = vmatpush1.bf16.msra.mxu1 %v2960_v3  ;;  %854 = vmatprep.subr.bf16.mxu0 %v2961_v4  ;;  %v2966_v7 = vld [vmem:[#allocation5 + $0x160] ss:$8 sps:$4 sm:$0xff]   ;;  %v2969_v9 = vld [vmem:[#allocation5 + $0x50] ss:$8 sps:$4 sm:$0xff]   ;;  %v2970_v10 = vld [vmem:[#allocation5 + $0x154] ss:$8 sps:$4 sm:$0xff]  }
  0x59   :  { %895 = vmatprep.subr.bf16.mxu1 %v2964_v6  ;;  %v2973_v11 = vld [vmem:[#allocation5 + $0x44] ss:$8 sps:$4 sm:$0xff]   ;;  %v2972_v12 = vld [vmem:[#allocation5 + $0x150] ss:$8 sps:$4 sm:$0xff]   ;;  %v2975_v14 = vld [vmem:[#allocation5 + $0x40] ss:$8 sps:$4 sm:$0xff]  }
  0x5a   :  { %v2976_v13 = vld [vmem:[#allocation5 + $0x144] ss:$8 sps:$4 sm:$0xff]   ;;  %v2979_v15 = vld [vmem:[#allocation5 + $0x34] ss:$8 sps:$4 sm:$0xff]   ;;  %v2978_v16 = vld [vmem:[#allocation5 + $0x140] ss:$8 sps:$4 sm:$0xff]  }
  0x5b   :  { %855 = vmatpush1.bf16.msra.mxu0 %v2963_v5  ;;  %v2982_v17 = vld [vmem:[#allocation5 + $0x134] ss:$8 sps:$4 sm:$0xff]   ;;  %v2981_v18 = vld [vmem:[#allocation5 + $0x30] ss:$8 sps:$4 sm:$0xff]   ;;  %v2985_v19 = vld [vmem:[#allocation5 + $0x24] ss:$8 sps:$4 sm:$0xff]  }
  0x5c   :  { %856 = vmatprep.subr.bf16.mxu0 %v2967_v8  ;;  %896 = vmatpush1.bf16.msra.mxu1 %v2966_v7  ;;  %v2984_v20 = vld [vmem:[#allocation5 + $0x130] ss:$8 sps:$4 sm:$0xff]   ;;  %v2988_v21 = vld [vmem:[#allocation5 + $0x124] ss:$8 sps:$4 sm:$0xff]   ;;  %v2987_v22 = vld [vmem:[#allocation5 + $0x20] ss:$8 sps:$4 sm:$0xff]  }
  0x5d   :  { %897 = vmatprep.subr.bf16.mxu1 %v2970_v10  ;;  %v2991_v23 = vld [vmem:[#allocation5 + $0x14] ss:$8 sps:$4 sm:$0xff]   ;;  %v2990_v24 = vld [vmem:[#allocation5 + $0x120] ss:$8 sps:$4 sm:$0xff]   ;;  %v2993_v26 = vld [vmem:[#allocation5 + $0x10] ss:$8 sps:$4 sm:$0xff]  }
  0x5e   :  { %v2994_v25 = vld [vmem:[#allocation5 + $0x114] ss:$8 sps:$4 sm:$0xff]   ;;  %v2997_v27 = vld [vmem:[#allocation5 + $0x4] ss:$8 sps:$4 sm:$0xff]   ;;  %v2996_v28 = vld [vmem:[#allocation5 + $0x110] ss:$8 sps:$4 sm:$0xff]  }
  0x5f   :  { %857 = vmatpush1.bf16.msra.mxu0 %v2969_v9  ;;  %v3000_v29 = vld [vmem:[#allocation5 + $0x104] ss:$8 sps:$4 sm:$0xff]   ;;  %v2999_v30 = vld [vmem:[#allocation5] ss:$8 sps:$4 sm:$0xff]   ;;  %v3003_v31 = vld [vmem:[#allocation5 + $0xf4] ss:$8 sps:$4 sm:$0xff]  }
  0x60   :  { %858 = vmatprep.subr.bf16.mxu0 %v2973_v11  ;;  %898 = vmatpush1.bf16.msra.mxu1 %v2972_v12  ;;  %v3002_v32 = vld [vmem:[#allocation5 + $0x100] ss:$8 sps:$4 sm:$0xff]   ;;  %v3006_v33 = vld [vmem:[#allocation5 + $0x1f4] ss:$8 sps:$4 sm:$0xff]   ;;  %v3005_v34 = vld [vmem:[#allocation5 + $0xf0] ss:$8 sps:$4 sm:$0xff]  }
  0x61   :  { %899 = vmatprep.subr.bf16.mxu1 %v2976_v13  ;;  %v3009_v35 = vld [vmem:[#allocation5 + $0xe4] ss:$8 sps:$4 sm:$0xff]   ;;  %v3008_v36 = vld [vmem:[#allocation5 + $0x1f0] ss:$8 sps:$4 sm:$0xff]   ;;  %v3011_v38 = vld [vmem:[#allocation5 + $0xe0] ss:$8 sps:$4 sm:$0xff]  }
  0x62   :  { %v3012_v37 = vld [vmem:[#allocation5 + $0x1e4] ss:$8 sps:$4 sm:$0xff]   ;;  %v3015_v39 = vld [vmem:[#allocation5 + $0xd4] ss:$8 sps:$4 sm:$0xff]   ;;  %v3014_v40 = vld [vmem:[#allocation5 + $0x1e0] ss:$8 sps:$4 sm:$0xff]  }
  0x63   :  { %859 = vmatpush1.bf16.msra.mxu0 %v2975_v14  ;;  %v3018_v41 = vld [vmem:[#allocation5 + $0x1d4] ss:$8 sps:$4 sm:$0xff]   ;;  %v3017_v42 = vld [vmem:[#allocation5 + $0xd0] ss:$8 sps:$4 sm:$0xff]   ;;  %v3021_v43 = vld [vmem:[#allocation5 + $0xc4] ss:$8 sps:$4 sm:$0xff]  }
  0x64   :  { %860 = vmatprep.subr.bf16.mxu0 %v2979_v15  ;;  %900 = vmatpush1.bf16.msra.mxu1 %v2978_v16  ;;  %v3020_v44 = vld [vmem:[#allocation5 + $0x1d0] ss:$8 sps:$4 sm:$0xff]   ;;  %v3024_v45 = vld [vmem:[#allocation5 + $0x1c4] ss:$8 sps:$4 sm:$0xff]   ;;  %v3023_v47 = vld [vmem:[#allocation5 + $0xc0] ss:$8 sps:$4 sm:$0xff]  }
  0x65   :  { %901 = vmatprep.subr.bf16.mxu1 %v2982_v17  ;;  %v139_v46 = vld [vmem:[#allocation2] sm:$0xff]  ;;  %v3027_v49 = vld [vmem:[#allocation5 + $0xb4] ss:$8 sps:$4 sm:$0xff]   ;;  %v140_v50 = vld [vmem:[#allocation2 + $0x8] sm:$0xff]  ;;  %v3557_v15 = vmov 0   ;;  %vm3559_vm0 = vmmov 0  }
  0x66   :  { %v2548_v48 = vcombine.high %v139_v46, %v139_v46  ;;  %v3026_v51 = vld [vmem:[#allocation5 + $0x1c0] ss:$8 sps:$4 sm:$0xff]   ;;  %v2550_v52 = vcombine.high %v140_v50, %v140_v50  ;;  %v3030_v53 = vld [vmem:[#allocation5 + $0x1b4] ss:$8 sps:$4 sm:$0xff]   ;;  %v3029_v54 = vld [vmem:[#allocation5 + $0xb0] ss:$8 sps:$4 sm:$0xff]   ;;  %v2547_v5 = vcombine.low %v139_v46, %v139_v46  ;;  %v2549_v8 = vcombine.low %v140_v50, %v140_v50 }
  0x67   :  { %861 = vmatpush1.bf16.msra.mxu0 %v2981_v18  ;;  %v3033_v55 = vld [vmem:[#allocation5 + $0xa4] ss:$8 sps:$4 sm:$0xff]   ;;  %v3032_v56 = vld [vmem:[#allocation5 + $0x1b0] ss:$8 sps:$4 sm:$0xff]   ;;  %v3035_v58 = vld [vmem:[#allocation5 + $0xa0] ss:$8 sps:$4 sm:$0xff]  }
  0x68   :  { %862 = vmatprep.subr.bf16.mxu0 %v2985_v19  ;;  %902 = vmatpush1.bf16.msra.mxu1 %v2984_v20  ;;  %v3036_v57 = vld [vmem:[#allocation5 + $0x1a4] ss:$8 sps:$4 sm:$0xff]   ;;  %v3039_v59 = vld [vmem:[#allocation5 + $0x94] ss:$8 sps:$4 sm:$0xff]   ;;  %v3038_v60 = vld [vmem:[#allocation5 + $0x1a0] ss:$8 sps:$4 sm:$0xff]  }
  0x69   :  { %903 = vmatprep.subr.bf16.mxu1 %v2988_v21  ;;  %884 = vmatprep.mubr.bf16.mxu0 %v2548_v48  ;;  %v3042_v61 = vld [vmem:[#allocation5 + $0x194] ss:$8 sps:$4 sm:$0xff]   ;;  %v3041_v62 = vld [vmem:[#allocation5 + $0x90] ss:$8 sps:$4 sm:$0xff]   ;;  %v3045_v63 = vld [vmem:[#allocation5 + $0x84] ss:$8 sps:$4 sm:$0xff]  }
  0x6a   :  { %925 = vmatprep.mubr.bf16.mxu1 %v2550_v52  ;;  %v3044_v0 = vld [vmem:[#allocation5 + $0x190] ss:$8 sps:$4 sm:$0xff]   ;;  %v3048_v1 = vld [vmem:[#allocation5 + $0x184] ss:$8 sps:$4 sm:$0xff]   ;;  %v3047_v2 = vld [vmem:[#allocation5 + $0x80] ss:$8 sps:$4 sm:$0xff]  }
  0x6b   :  { %863 = vmatpush1.bf16.msra.mxu0 %v2987_v22  ;;  %v3055_v3 = vld [vmem:[#allocation5 + $0x274] ss:$8 sps:$4 sm:$0xff]   ;;  %v3052_v4 = vld [vmem:[#allocation5 + $0x180] ss:$8 sps:$4 sm:$0xff]   ;;  %v3053_v7 = vld [vmem:[#allocation5 + $0x270] ss:$8 sps:$4 sm:$0xff]  }
  0x6c   :  { %864 = vmatprep.subr.bf16.mxu0 %v2991_v23  ;;  %904 = vmatpush1.bf16.msra.mxu1 %v2990_v24  ;;  %v3081_v6 = vld [vmem:[#allocation5 + $0x374] ss:$8 sps:$4 sm:$0xff]   ;;  %v3060_v9 = vld [vmem:[#allocation5 + $0x264] ss:$8 sps:$4 sm:$0xff]   ;;  %v3079_v10 = vld [vmem:[#allocation5 + $0x370] ss:$8 sps:$4 sm:$0xff]  }
  0x6d   :  { %905 = vmatprep.subr.bf16.mxu1 %v2994_v25  ;;  %v3087_v11 = vld [vmem:[#allocation5 + $0x364] ss:$8 sps:$4 sm:$0xff]   ;;  %v3058_v12 = vld [vmem:[#allocation5 + $0x260] ss:$8 sps:$4 sm:$0xff]   ;;  %v3063_v13 = vld [vmem:[#allocation5 + $0x254] ss:$8 sps:$4 sm:$0xff]  }
  0x6e   :  { %v3085_v14 = vld [vmem:[#allocation5 + $0x360] ss:$8 sps:$4 sm:$0xff]   ;;  %v3093_v16 = vld [vmem:[#allocation5 + $0x354] ss:$8 sps:$4 sm:$0xff]   ;;  %v3061_v17 = vld [vmem:[#allocation5 + $0x250] ss:$8 sps:$4 sm:$0xff]  }
  0x6f   :  { %865 = vmatpush1.bf16.msra.mxu0 %v2993_v26  ;;  %v3066_v18 = vld [vmem:[#allocation5 + $0x244] ss:$8 sps:$4 sm:$0xff]   ;;  %v3064_v19 = vld [vmem:[#allocation5 + $0x240] ss:$8 sps:$4 sm:$0xff]   ;;  %v3091_v20 = vld [vmem:[#allocation5 + $0x350] ss:$8 sps:$4 sm:$0xff]  }
  0x70   :  { %866 = vmatprep.subr.bf16.mxu0 %v2997_v27  ;;  %906 = vmatpush1.bf16.msra.mxu1 %v2996_v28  ;;  %v3099_v21 = vld [vmem:[#allocation5 + $0x344] ss:$8 sps:$4 sm:$0xff]   ;;  %v3069_v22 = vld [vmem:[#allocation5 + $0x234] ss:$8 sps:$4 sm:$0xff]   ;;  %v3097_v23 = vld [vmem:[#allocation5 + $0x340] ss:$8 sps:$4 sm:$0xff]  }
  0x71   :  { %907 = vmatprep.subr.bf16.mxu1 %v3000_v29  ;;  %v3105_v24 = vld [vmem:[#allocation5 + $0x334] ss:$8 sps:$4 sm:$0xff]   ;;  %v3067_v26 = vld [vmem:[#allocation5 + $0x230] ss:$8 sps:$4 sm:$0xff]   ;;  %v3072_v28 = vld [vmem:[#allocation5 + $0x224] ss:$8 sps:$4 sm:$0xff]  }
  0x72   :  { %v3662_v25 = vld [vmem:[#allocation2 + $0x10] sm:$0xff]  ;;  %v3102_v48 = vld [vmem:[#allocation5 + $0x2c4] ss:$8 sps:$4 sm:$0xff]  }
  0x73   :  { %867 = vmatpush1.bf16.msra.mxu0 %v2999_v30  ;;  %v2552_v27 = vcombine.high %v3662_v25, %v3662_v25  ;;  %v3103_v29 = vld [vmem:[#allocation5 + $0x330] ss:$8 sps:$4 sm:$0xff]   ;;  %v3111_v30 = vld [vmem:[#allocation5 + $0x324] ss:$8 sps:$4 sm:$0xff]   ;;  %v3096_v46 = vld [vmem:[#allocation5 + $0x2d4] ss:$8 sps:$4 sm:$0xff]  }
  0x74   :  { %868 = vmatprep.subr.bf16.mxu0 %v3003_v31  ;;  %908 = vmatpush1.bf16.msra.mxu1 %v3002_v32  ;;  %v3070_v31 = vld [vmem:[#allocation5 + $0x220] ss:$8 sps:$4 sm:$0xff]   ;;  %v3075_v32 = vld [vmem:[#allocation5 + $0x214] ss:$8 sps:$4 sm:$0xff]   ;;  %v3114_v52 = vld [vmem:[#allocation5 + $0x2a4] ss:$8 sps:$4 sm:$0xff]  }
  0x75   :  { %909 = vmatprep.subr.bf16.mxu1 %v3006_v33  ;;  %v3109_v33 = vld [vmem:[#allocation5 + $0x320] ss:$8 sps:$4 sm:$0xff]   ;;  %v3108_v50 = vld [vmem:[#allocation5 + $0x2b4] ss:$8 sps:$4 sm:$0xff]  }
  0x77   :  { %869 = vmatpush2.bf16.msra.mxu0 %v3005_v34  ;;  %v3117_v34 = vld [vmem:[#allocation5 + $0x314] ss:$8 sps:$4 sm:$0xff]  }
  0x78   :  { %870 = vmatprep.subr.bf16.mxu0 %v3009_v35  ;;  %910 = vmatpush2.bf16.msra.mxu1 %v3008_v36  ;;  %v3073_v35 = vld [vmem:[#allocation5 + $0x210] ss:$8 sps:$4 sm:$0xff]   ;;  %v3078_v36 = vld [vmem:[#allocation5 + $0x204] ss:$8 sps:$4 sm:$0xff]  }
  0x79   :  { %911 = vmatprep.subr.bf16.mxu1 %v3012_v37  ;;  %v3115_v37 = vld [vmem:[#allocation5 + $0x310] ss:$8 sps:$4 sm:$0xff]  }
  0x7b   :  { %871 = vmatpush2.bf16.msra.mxu0 %v3011_v38  ;;  %v3123_v38 = vld [vmem:[#allocation5 + $0x304] ss:$8 sps:$4 sm:$0xff]  }
  0x7c   :  { %872 = vmatprep.subr.bf16.mxu0 %v3015_v39  ;;  %912 = vmatpush2.bf16.msra.mxu1 %v3014_v40  ;;  %v3076_v39 = vld [vmem:[#allocation5 + $0x200] ss:$8 sps:$4 sm:$0xff]   ;;  %v3084_v40 = vld [vmem:[#allocation5 + $0x2f4] ss:$8 sps:$4 sm:$0xff]  }
  0x7d   :  { %913 = vmatprep.subr.bf16.mxu1 %v3018_v41  ;;  %v3121_v41 = vld [vmem:[#allocation5 + $0x300] ss:$8 sps:$4 sm:$0xff]  }
  0x7f   :  { %873 = vmatpush2.bf16.msra.mxu0 %v3017_v42  ;;  %v3082_v42 = vld [vmem:[#allocation5 + $0x2f0] ss:$8 sps:$4 sm:$0xff]  }
  0x80   :  { %874 = vmatprep.subr.bf16.mxu0 %v3021_v43  ;;  %914 = vmatpush2.bf16.msra.mxu1 %v3020_v44  ;;  %v3090_v43 = vld [vmem:[#allocation5 + $0x2e4] ss:$8 sps:$4 sm:$0xff]   ;;  %v3127_v44 = vld [vmem:[#allocation2 + $0x18] ss:$0 sps:$4 sm:$0xff]  }
  0x81   :  { %915 = vmatprep.subr.bf16.mxu1 %v3024_v45  ;;  %v3088_v45 = vld [vmem:[#allocation5 + $0x2e0] ss:$8 sps:$4 sm:$0xff]  }
  0x83   :  { %875 = vmatpush2.bf16.msra.mxu0 %v3023_v47  ;;  %v3094_v47 = vld [vmem:[#allocation5 + $0x2d0] ss:$8 sps:$4 sm:$0xff]  }
  0x84   :  { %876 = vmatprep.subr.bf16.mxu0 %v3027_v49  ;;  %916 = vmatpush2.bf16.msra.mxu1 %v3026_v51  ;;  %v3100_v49 = vld [vmem:[#allocation5 + $0x2c0] ss:$8 sps:$4 sm:$0xff]   ;;  %v3106_v51 = vld [vmem:[#allocation5 + $0x2b0] ss:$8 sps:$4 sm:$0xff]  }
  0x85   :  { %917 = vmatprep.subr.bf16.mxu1 %v3030_v53  ;;  %v3112_v53 = vld [vmem:[#allocation5 + $0x2a0] ss:$8 sps:$4 sm:$0xff]  }
  0x87   :  { %877 = vmatpush2.bf16.msra.mxu0 %v3029_v54  ;;  %v3120_v54 = vld [vmem:[#allocation5 + $0x294] ss:$8 sps:$4 sm:$0xff]  }
  0x88   :  { %878 = vmatprep.subr.bf16.mxu0 %v3033_v55  ;;  %918 = vmatpush2.bf16.msra.mxu1 %v3032_v56  ;;  %v3118_v55 = vld [vmem:[#allocation5 + $0x290] ss:$8 sps:$4 sm:$0xff]   ;;  %v3126_v56 = vld [vmem:[#allocation5 + $0x284] ss:$8 sps:$4 sm:$0xff]  }
  0x89   :  { %919 = vmatprep.subr.bf16.mxu1 %v3036_v57  ;;  %v3124_v57 = vld [vmem:[#allocation5 + $0x280] ss:$8 sps:$4 sm:$0xff]  }
  0x8b   :  { %879 = vmatpush2.bf16.msra.mxu0 %v3035_v58  ;;  %v2551_v58 = vcombine.low %v3662_v25, %v3662_v25 }
  0x8c   :  { %880 = vmatprep.subr.bf16.mxu0 %v3039_v59  ;;  %920 = vmatpush2.bf16.msra.mxu1 %v3038_v60  ;;  %v3130_v59 = vld [vmem:[#allocation7 + $0x78] sm:$0xff]  }
  0x8d   :  { %921 = vmatprep.subr.bf16.mxu1 %v3042_v61  ;;  %v3131_v60 = vld [vmem:[#allocation7 + $0x38] sm:$0xff]   ;;  %v3132_v61 = vld [vmem:[#allocation7 + $0x70] sm:$0xff]  }
  0x8f   :  { %881 = vmatpush2.bf16.msra.mxu0 %v3041_v62  ;;  %v3133_v62 = vld [vmem:[#allocation7 + $0x30] sm:$0xff]  }
  0x90   :  { %882 = vmatprep.subr.bf16.mxu0 %v3045_v63  ;;  %922 = vmatpush2.bf16.msra.mxu1 %v3044_v0  ;;  %v3134_v63 = vld [vmem:[#allocation7 + $0x68] sm:$0xff]  }
  0x91   :  { %923 = vmatprep.subr.bf16.mxu1 %v3048_v1  ;;  %v3135_v0 = vld [vmem:[#allocation7 + $0x28] sm:$0xff]   ;;  %v3136_v1 = vld [vmem:[#allocation7 + $0x60] sm:$0xff]  }
  0x93   :  { %883 = vmatpush2.bf16.msra.mxu0 %v3047_v2  ;;  %v3137_v2 = vld [vmem:[#allocation7 + $0x20] sm:$0xff]  }
  0x94   :  { %934 = vmatprep.subr.bf16.mxu0 %v3055_v3  ;;  %924 = vmatpush2.bf16.msra.mxu1 %v3052_v4  ;;  %v3138_v3 = vld [vmem:[#allocation7 + $0x58] sm:$0xff]  }
  0x95   :  { %975 = vmatprep.subr.bf16.mxu1 %v3081_v6  ;;  %v3139_v4 = vld [vmem:[#allocation7 + $0x18] sm:$0xff]   ;;  %v3141_v6 = vld [vmem:[#allocation7 + $0x10] sm:$0xff]  }
  0x96   :  { %885 = vmatmul.mubr.bf16.vlgmr.msra.gmra.mxu0 %v2547_v5  ;;  %v3140_v5 = vld [vmem:[#allocation7 + $0x50] sm:$0xff]  }
  0x97   :  { %935 = vmatpush1.bf16.msra.mxu0 %v3053_v7  ;;  %926 = vmatmul.mubr.bf16.vlgmr.msra.gmra.mxu1 %v2549_v8  ;;  %v3142_v7 = vld [vmem:[#allocation7 + $0x48] sm:$0xff]  }
  0x98   :  { %936 = vmatprep.subr.bf16.mxu0 %v3060_v9  ;;  %976 = vmatpush1.bf16.msra.mxu1 %v3079_v10  ;;  %v3143_v8 = vld [vmem:[#allocation7 + $0x8] sm:$0xff]   ;;  %v3144_v9 = vld [vmem:[#allocation7 + $0x40] sm:$0xff]  }
  0x99   :  { %1007 = vmatprep.mubr.bf16.mxu1 %v3557_v15  ;;  %977 = vmatprep.subr.bf16.mxu1 %v3087_v11  ;;  %v3145_v10 = vld [vmem:[#allocation7] sm:$0xff]   ;;  %v3146_v11 = vld [vmem:[#allocation8 + $0x38] sm:$0xff]  }
  0x9a   :  { %966 = vmatprep.mubr.bf16.mxu0 %v2552_v27 }
  0x9b   :  { %937 = vmatpush1.bf16.msra.mxu0 %v3058_v12  ;;  %v3558_v12 = vmov 0.0  }
  0x9c   :  { %938 = vmatprep.subr.bf16.mxu0 %v3063_v13  ;;  %978 = vmatpush1.bf16.msra.mxu1 %v3085_v14  ;;  %v3147_v13 = vld [vmem:[#allocation8 + $0x30] sm:$0xff]   ;;  %v3148_v14 = vld [vmem:[#allocation8 + $0x28] sm:$0xff]  }
  0x9d   :  { %979 = vmatprep.subr.bf16.mxu1 %v3093_v16  ;;  %v3149_v16 = vld [vmem:[#allocation8 + $0x20] sm:$0xff]  }
  0x9f   :  { %939 = vmatpush1.bf16.msra.mxu0 %v3061_v17  ;;  %v3150_v17 = vld [vmem:[#allocation8 + $0x18] sm:$0xff]  }
  0xa0   :  { %940 = vmatprep.subr.bf16.mxu0 %v3066_v18  ;;  %980 = vmatpush1.bf16.msra.mxu1 %v3091_v20 }
  0xa1   :  { %981 = vmatprep.subr.bf16.mxu1 %v3099_v21 }
  0xa3   :  { %941 = vmatpush1.bf16.msra.mxu0 %v3064_v19 }
  0xa4   :  { %942 = vmatprep.subr.bf16.mxu0 %v3069_v22  ;;  %982 = vmatpush1.bf16.msra.mxu1 %v3097_v23 }
  0xa5   :  { %983 = vmatprep.subr.bf16.mxu1 %v3105_v24 }
  0xa7   :  { %943 = vmatpush1.bf16.msra.mxu0 %v3067_v26 }
  0xa8   :  { %944 = vmatprep.subr.bf16.mxu0 %v3072_v28  ;;  %984 = vmatpush1.bf16.msra.mxu1 %v3103_v29 }
  0xa9   :  { %985 = vmatprep.subr.bf16.mxu1 %v3111_v30  ;;  %v257_v30 = vlaneseq }
  0xab   :  { %945 = vmatpush1.bf16.msra.mxu0 %v3070_v31  ;;  %v3675_v31 = vshrl.u32 %v257_v30, 7 }
  0xac   :  { %946 = vmatprep.subr.bf16.mxu0 %v3075_v32  ;;  %986 = vmatpush1.bf16.msra.mxu1 %v3109_v33  ;;  %v255_v33 = vld [vmem:[%s3735_s2] sm:$0x3] }
  0xad   :  { %987 = vmatprep.subr.bf16.mxu1 %v3117_v34  ;;  %v3678_v32 = vsub.s32 0, %v3675_v31  ;;  %v3684_v34 = vsub.s32 1, %v3675_v31 }
  0xaf   :  { %947 = vmatpush1.bf16.msra.mxu0 %v3073_v35  ;;  %v260_v35 = vrot.slane %v255_v33, %v3678_v32 }
  0xb0   :  { %948 = vmatprep.subr.bf16.mxu0 %v3078_v36  ;;  %988 = vmatpush1.bf16.msra.mxu1 %v3115_v37  ;;  %v264_v36 = vrot.slane %v255_v33, %v3684_v34  ;;  %v3185_v33 = vld [vmem:[#allocation11 + $0x4] ss:$8 sps:$4 sm:$0xff]  }
  0xb1   :  { %989 = vmatprep.subr.bf16.mxu1 %v3123_v38 }
  0xb3   :  { %949 = vmatpush1.bf16.msra.mxu0 %v3076_v39 }
  0xb4   :  { %950 = vmatprep.subr.bf16.mxu0 %v3084_v40  ;;  %990 = vmatpush1.bf16.msra.mxu1 %v3121_v41 }
  0xb5   :  { %2836 = vmatprep.subr.bf16.mxu1 %v3130_v59  ;;  %v3157_v59 = vld [vmem:[#allocation10 + $0x20] sm:$0xff]  }
  0xb7   :  { %951 = vmatpush2.bf16.msra.mxu0 %v3082_v42  ;;  %1008 = vmatmul.mubr.bf16.vlgmr.msra.gmra.mxu1 %v3127_v44 }
  0xb8   :  { %952 = vmatprep.subr.bf16.mxu0 %v3090_v43  ;;  %2837 = vmatpush3.bf16.msra.mxu1 %v3131_v60  ;;  %v3158_v60 = vld [vmem:[#allocation10 + $0x18] sm:$0xff]  }
  0xb9   :  { %2838 = vmatprep.subr.bf16.mxu1 %v3132_v61  ;;  %v3159_v61 = vld [vmem:[#allocation10 + $0x10] sm:$0xff]  }
  0xbb   :  { %953 = vmatpush2.bf16.msra.mxu0 %v3088_v45 }
  0xbc   :  { %954 = vmatprep.subr.bf16.mxu0 %v3096_v46  ;;  %2839 = vmatpush3.bf16.msra.mxu1 %v3133_v62 }
  0xbd   :  { %2840 = vmatprep.subr.bf16.mxu1 %v3134_v63  ;;  %v2666_v63 = vld [vmem:[%s3737_s4] ss:$0 sm:$0xff] }
  0xbf   :  { %955 = vmatpush2.bf16.msra.mxu0 %v3094_v47 }
  0xc0   :  { %956 = vmatprep.subr.bf16.mxu0 %v3102_v48  ;;  %2841 = vmatpush3.bf16.msra.mxu1 %v3135_v0 }
  0xc1   :  { %2842 = vmatprep.subr.bf16.mxu1 %v3136_v1 }
  0xc3   :  { %957 = vmatpush2.bf16.msra.mxu0 %v3100_v49 }
  0xc4   :  { %958 = vmatprep.subr.bf16.mxu0 %v3108_v50  ;;  %2843 = vmatpush3.bf16.msra.mxu1 %v3137_v2 }
  0xc5   :  { %2844 = vmatprep.subr.bf16.mxu1 %v3138_v3 }
  0xc7   :  { %959 = vmatpush2.bf16.msra.mxu0 %v3106_v51 }
  0xc8   :  { %960 = vmatprep.subr.bf16.mxu0 %v3114_v52  ;;  %2845 = vmatpush3.bf16.msra.mxu1 %v3139_v4 }
  0xc9   :  { %2846 = vmatprep.subr.bf16.mxu1 %v3140_v5 }
  0xcb   :  { %961 = vmatpush2.bf16.msra.mxu0 %v3112_v53  ;;  %v3151_v53 = vld [vmem:[#allocation8 + $0x10] sm:$0xff]  }
  0xcc   :  { %962 = vmatprep.subr.bf16.mxu0 %v3120_v54  ;;  %2847 = vmatpush3.bf16.msra.mxu1 %v3141_v6  ;;  %v3152_v54 = vld [vmem:[#allocation8 + $0x8] sm:$0xff]  }
  0xcd   :  { %2848 = vmatprep.subr.bf16.mxu1 %v3142_v7  ;;  %v3160_v7 = vld [vmem:[#allocation10 + $0x8] sm:$0xff]  }
  0xcf   :  { %963 = vmatpush2.bf16.msra.mxu0 %v3118_v55  ;;  %v3153_v55 = vld [vmem:[#allocation8] sm:$0xff]  }
  0xd0   :  { %964 = vmatprep.subr.bf16.mxu0 %v3126_v56  ;;  %2849 = vmatpush3.bf16.msra.mxu1 %v3143_v8  ;;  %v3154_v56 = vld [vmem:[#allocation10 + $0x38] sm:$0xff]   ;;  %v3161_v8 = vld [vmem:[#allocation10] sm:$0xff]  }
  0xd1   :  { %2850 = vmatprep.subr.bf16.mxu1 %v3144_v9  ;;  %v3162_v9 = vld [vmem:[#allocation11 + $0x70] ss:$8 sps:$4 sm:$0xff]  }
  0xd3   :  { %965 = vmatpush2.bf16.msra.mxu0 %v3124_v57  ;;  %v3155_v57 = vld [vmem:[#allocation10 + $0x30] sm:$0xff]  }
  0xd4   :  { %2851 = vmatpush3.bf16.msra.mxu1 %v3145_v10  ;;  %2898 = vmatprep.subr.bf16.mxu0 %v3558_v12  ;;  %v3164_v10 = vld [vmem:[#allocation11 + $0x74] ss:$8 sps:$4 sm:$0xff]  }
  0xd5   :  { %2918 = vmatprep.subr.bf16.mxu1 %v3558_v12 }
  0xd6   :  { %967 = vmatmul.mubr.bf16.vlgmr.msra.gmra.mxu0 %v2551_v58  ;;  %v3156_v58 = vld [vmem:[#allocation10 + $0x28] sm:$0xff]  }
  0xd7   :  { %2899 = vmatpush3.bf16.msra.mxu0 %v3146_v11  ;;  %2914 = vmatprep.mubr.msk.bf16.mxu0 %vm3559_vm0, %v3558_v12  ;;  %v3167_v11 = vld [vmem:[#allocation11 + $0x64] ss:$8 sps:$4 sm:$0xff]  }
  0xd8   :  { %2900 = vmatprep.subr.bf16.mxu0 %v3558_v12 }
  0xdb   :  { %2901 = vmatpush3.bf16.msra.mxu0 %v3147_v13  ;;  %v3165_v13 = vld [vmem:[#allocation11 + $0x60] ss:$8 sps:$4 sm:$0xff]  }
  0xdc   :  { %2902 = vmatprep.subr.bf16.mxu0 %v3558_v12 }
  0xdf   :  { %2903 = vmatpush3.bf16.msra.mxu0 %v3148_v14  ;;  %v3170_v14 = vld [vmem:[#allocation11 + $0x54] ss:$8 sps:$4 sm:$0xff]  }
  0xe0   :  { %2904 = vmatprep.subr.bf16.mxu0 %v3558_v12 }
  0xe3   :  { %2905 = vmatpush3.bf16.msra.mxu0 %v3149_v16  ;;  %v3168_v16 = vld [vmem:[#allocation11 + $0x50] ss:$8 sps:$4 sm:$0xff]  }
  0xe4   :  { %2906 = vmatprep.subr.bf16.mxu0 %v3558_v12 }
  0xe7   :  { %2907 = vmatpush3.bf16.msra.mxu0 %v3150_v17  ;;  %v3173_v17 = vld [vmem:[#allocation11 + $0x44] ss:$8 sps:$4 sm:$0xff]  }
  0xe8   :  { %2908 = vmatprep.subr.bf16.mxu0 %v3558_v12 }
  0xeb   :  { %2909 = vmatpush3.bf16.msra.mxu0 %v3151_v53  ;;  %v3236_v53 = vld [vmem:[#allocation13 + $0x34c] ss:$28 sps:$4 sm:$0xff]  }
  0xec   :  { %2910 = vmatprep.subr.bf16.mxu0 %v3558_v12 }
  0xef   :  { %2911 = vmatpush3.bf16.msra.mxu0 %v3152_v54  ;;  %v3234_v54 = vld [vmem:[#allocation13 + $0x348] ss:$28 sps:$4 sm:$0xff]  }
  0xf0   :  { %2912 = vmatprep.subr.bf16.mxu0 %v3558_v12 }
  0xf3   :  { %2913 = vmatpush3.bf16.msra.mxu0 %v3153_v55  ;;  %v3242_v55 = vld [vmem:[#allocation13 + $0x314] ss:$28 sps:$4 sm:$0xff]  }
  0xf4   :  { %1531 = vmatprep.subr.bf16.mxu0 %v3164_v10 }
 0x156   :  { %v886_v18 = vpop.f32.mrf.mxu0 }
 0x157   :  { %v927_v20 = vpop.f32.mrf.mxu1  ;;  %v887_v37 = vadd.f32 %v886_v18, %v260_v35  ;;  %v3176_v18 = vld [vmem:[#allocation11 + $0x34] ss:$8 sps:$4 sm:$0xff]   ;;  %v3183_v35 = vld [vmem:[#allocation11] ss:$8 sps:$4 sm:$0xff]  }
 0x158   :  { %v888_v19 = vpop.f32.mrf.mxu0 }
 0x159   :  { %v929_v22 = vpop.f32.mrf.mxu1  ;;  %v889_v38 = vadd.f32 %v888_v19, %v264_v36  ;;  %v928_v39 = vadd.f32 %v927_v20, %v887_v37  ;;  %v3179_v19 = vld [vmem:[#allocation11 + $0x24] ss:$8 sps:$4 sm:$0xff]   ;;  %v3177_v20 = vld [vmem:[#allocation11 + $0x20] ss:$8 sps:$4 sm:$0xff]  }
 0x15a   :  { %v890_v21 = vpop.f32.mrf.mxu0  ;;  %v3186_v36 = vld [vmem:[#allocation13 + $0x188] ss:$28 sps:$4 sm:$0xff]  }
 0x15b   :  { %v931_v24 = vpop.f32.mrf.mxu1  ;;  %v930_v41 = vadd.f32 %v929_v22, %v889_v38  ;;  %v3182_v21 = vld [vmem:[#allocation11 + $0x14] ss:$8 sps:$4 sm:$0xff]   ;;  %v3180_v22 = vld [vmem:[#allocation11 + $0x10] ss:$8 sps:$4 sm:$0xff]   ;;  %v3188_v37 = vld [vmem:[#allocation13 + $0x18c] ss:$28 sps:$4 sm:$0xff]  }
 0x15c   :  { %v891_v23 = vpop.f32.mrf.mxu0  ;;  %v3191_v38 = vld [vmem:[#allocation13 + $0x194] ss:$28 sps:$4 sm:$0xff]  }
 0x15d   :  { %v932_v25 = vpop.f32.mrf.mxu1  ;;  %v2683_v23 = vld [vmem:[%s3739_s6] ss:$0 sm:$0xff] }
 0x177   :  { %v1009_v26 = vpop.f32.mrf.mxu1 }
 0x179   :  { %v1011_v27 = vpop.f32.mrf.mxu1 }
 0x17b   :  { %v1013_v28 = vpop.f32.mrf.mxu1 }
 0x17d   :  { %v1014_v29 = vpop.f32.mrf.mxu1 }
 0x196   :  { %v968_v40 = vpop.f32.mrf.mxu0 }
 0x197   :  { %v969_v42 = vadd.f32 %v968_v40, %v928_v39  ;;  %v3194_v39 = vld [vmem:[#allocation13 + $0x154] ss:$28 sps:$4 sm:$0xff]  }
 0x198   :  { %v970_v43 = vpop.f32.mrf.mxu0  ;;  %v3192_v40 = vld [vmem:[#allocation13 + $0x150] ss:$28 sps:$4 sm:$0xff]  }
 0x199   :  { %v1010_v44 = vadd.f32 %v1009_v26, %v969_v42  ;;  %v971_v45 = vadd.f32 %v970_v43, %v930_v41  ;;  %v3200_v41 = vld [vmem:[#allocation13 + $0x11c] ss:$28 sps:$4 sm:$0xff]   ;;  %v3206_v43 = vld [vmem:[#allocation13 + $0xe4] ss:$28 sps:$4 sm:$0xff]  }
 0x19a   :  { %v972_v46 = vpop.f32.mrf.mxu0  ;;  %v3198_v42 = vld [vmem:[#allocation13 + $0x118] ss:$28 sps:$4 sm:$0xff]  }
 0x19b   :  { %v1012_v47 = vadd.f32 %v1011_v27, %v971_v45  ;;  %v1016_v48 = vmax.f32 %v1010_v44, 0.0  ;;  %v3204_v44 = vld [vmem:[#allocation13 + $0xe0] ss:$28 sps:$4 sm:$0xff]   ;;  %v3212_v45 = vld [vmem:[#allocation13 + $0xac] ss:$28 sps:$4 sm:$0xff]  }
 0x19c   :  { %v973_v49 = vpop.f32.mrf.mxu0  ;;  %v3210_v46 = vld [vmem:[#allocation13 + $0xa8] ss:$28 sps:$4 sm:$0xff]  }
 0x19d   :  { %v1017_v50 = vmax.f32 %v1012_v47, 0.0  ;;  %v1018_v52 = vpack.c.bf16 %v1016_v48, %v1016_v48  ;;  %v3218_v47 = vld [vmem:[#allocation13 + $0x74] ss:$28 sps:$4 sm:$0xff]   ;;  %v3224_v49 = vld [vmem:[#allocation13 + $0x3c] ss:$28 sps:$4 sm:$0xff]  }
 0x19e   :  { %v3216_v48 = vld [vmem:[#allocation13 + $0x70] ss:$28 sps:$4 sm:$0xff]  }
 0x19f   :  { %v1019_v51 = vpack.c.bf16 %v1017_v50, %v1017_v50  ;;  %v3222_v50 = vld [vmem:[#allocation13 + $0x38] ss:$28 sps:$4 sm:$0xff]  }
 0x1a1   :  { %1187 = vmatprep.mubr.bf16.mxu1 %v1019_v51  ;;  %v3230_v51 = vld [vmem:[#allocation13 + $0x4] ss:$28 sps:$4 sm:$0xff]  }
 0x1a2   :  { %1188 = vmatmul.mubr.bf16.vlgmr.msra.gmra.mxu1 %v1018_v52  ;;  %v3228_v52 = vld [vmem:[#allocation13] ss:$28 sps:$4 sm:$0xff]  }
 0x1a3   :  { %2934 = vmatprep.mubr.msk.bf16.mxu1 %vm3559_vm0, %v3558_v12  ;;  %2919 = vmatpush3.bf16.msra.mxu1 %v3154_v56  ;;  %v3240_v56 = vld [vmem:[#allocation13 + $0x310] ss:$28 sps:$4 sm:$0xff]  }
 0x1a4   :  { %2920 = vmatprep.subr.bf16.mxu1 %v3558_v12 }
 0x1a7   :  { %2921 = vmatpush3.bf16.msra.mxu1 %v3155_v57  ;;  %v3248_v57 = vld [vmem:[#allocation13 + $0x2dc] ss:$28 sps:$4 sm:$0xff]  }
 0x1a8   :  { %2922 = vmatprep.subr.bf16.mxu1 %v3558_v12 }
 0x1ab   :  { %2923 = vmatpush3.bf16.msra.mxu1 %v3156_v58  ;;  %v3246_v58 = vld [vmem:[#allocation13 + $0x2d8] ss:$28 sps:$4 sm:$0xff]  }
 0x1ac   :  { %2924 = vmatprep.subr.bf16.mxu1 %v3558_v12 }
 0x1af   :  { %2925 = vmatpush3.bf16.msra.mxu1 %v3157_v59  ;;  %v3254_v59 = vld [vmem:[#allocation13 + $0x2a4] ss:$28 sps:$4 sm:$0xff]  }
 0x1b0   :  { %2926 = vmatprep.subr.bf16.mxu1 %v3558_v12 }
 0x1b3   :  { %2927 = vmatpush3.bf16.msra.mxu1 %v3158_v60  ;;  %v3252_v60 = vld [vmem:[#allocation13 + $0x2a0] ss:$28 sps:$4 sm:$0xff]  }
 0x1b4   :  { %2928 = vmatprep.subr.bf16.mxu1 %v3558_v12 }
 0x1b7   :  { %2929 = vmatpush3.bf16.msra.mxu1 %v3159_v61  ;;  %v3260_v61 = vld [vmem:[#allocation13 + $0x26c] ss:$28 sps:$4 sm:$0xff]  }
 0x1b8   :  { %2930 = vmatprep.subr.bf16.mxu1 %v3558_v12 }
 0x1bb   :  { %2931 = vmatpush3.bf16.msra.mxu1 %v3160_v7  ;;  %v3189_v7 = vld [vmem:[#allocation13 + $0x190] ss:$28 sps:$4 sm:$0xff]  }
 0x1bc   :  { %2932 = vmatprep.subr.bf16.mxu1 %v3558_v12  ;;  %v3174_v12 = vld [vmem:[#allocation11 + $0x30] ss:$8 sps:$4 sm:$0xff]  }
 0x1bf   :  { %2933 = vmatpush3.bf16.msra.mxu1 %v3161_v8 }
 0x1c0   :  { %2317 = vmatprep.subr.bf16.mxu1 %v3188_v37  ;;  %v3269_v37 = vld [vmem:[#allocation13 + $0x23c] ss:$28 sps:$4 sm:$0xff]  }
 0x262   :  { %v2852_v62 = vpop.f32.mrf.mxu1 }
 0x264   :  { %v2853_v0 = vpop.f32.mrf.mxu1 }
 0x265   :  { %v2854_v1 = vadd.f32 %v2853_v0, %v2852_v62  ;;  %v3258_v62 = vld [vmem:[#allocation13 + $0x268] ss:$28 sps:$4 sm:$0xff]   ;;  %v3264_v0 = vld [vmem:[#allocation13 + $0x230] ss:$28 sps:$4 sm:$0xff]  }
 0x266   :  { %v2855_v2 = vpop.f32.mrf.mxu1 }
 0x267   :  { %v1190_v3 = vadd.f32 %v2854_v1, %v2666_v63  ;;  %v3266_v63 = vld [vmem:[#allocation13 + $0x234] ss:$28 sps:$4 sm:$0xff]   ;;  %v2692_v1 = vld [vmem:[%s3741_s8] ss:$0 sm:$0xff] }
 0x268   :  { %v2856_v4 = vpop.f32.mrf.mxu1 }
 0x269   :  { %v1195_v5 = vmax.f32 %v1190_v3, 0.0 }
 0x26b   :  { %v1196_v6 = vpack.c.bf16 %v1195_v5, %v1195_v5 }
 0x26d   :  { %2915 = vmatmul.mubr.bf16.vlgmr.msra.gmra.mxu0 %v1196_v6 }
 0x26e   :  { %1563 = vmatprep.mubr.bf16.mxu0 %v3557_v15  ;;  %1532 = vmatpush1.bf16.msra.mxu0 %v3162_v9  ;;  %v3171_v15 = vld [vmem:[#allocation11 + $0x40] ss:$8 sps:$4 sm:$0xff]   ;;  %v3197_v9 = vld [vmem:[#allocation13 + $0x15c] ss:$28 sps:$4 sm:$0xff]  }
 0x26f   :  { %1533 = vmatprep.subr.bf16.mxu0 %v3167_v11  ;;  %v3195_v11 = vld [vmem:[#allocation13 + $0x158] ss:$28 sps:$4 sm:$0xff]  }
 0x272   :  { %1534 = vmatpush1.bf16.msra.mxu0 %v3165_v13  ;;  %v3203_v13 = vld [vmem:[#allocation13 + $0x124] ss:$28 sps:$4 sm:$0xff]  }
 0x273   :  { %1535 = vmatprep.subr.bf16.mxu0 %v3170_v14  ;;  %v3201_v14 = vld [vmem:[#allocation13 + $0x120] ss:$28 sps:$4 sm:$0xff]  }
 0x276   :  { %1536 = vmatpush1.bf16.msra.mxu0 %v3168_v16  ;;  %v3209_v16 = vld [vmem:[#allocation13 + $0xec] ss:$28 sps:$4 sm:$0xff]  }
 0x277   :  { %1537 = vmatprep.subr.bf16.mxu0 %v3173_v17  ;;  %v3207_v17 = vld [vmem:[#allocation13 + $0xe8] ss:$28 sps:$4 sm:$0xff]  }
 0x27a   :  { %1538 = vmatpush1.bf16.msra.mxu0 %v3171_v15  ;;  %v3215_v15 = vld [vmem:[#allocation13 + $0xb4] ss:$28 sps:$4 sm:$0xff]  }
 0x27b   :  { %1539 = vmatprep.subr.bf16.mxu0 %v3176_v18  ;;  %v3213_v18 = vld [vmem:[#allocation13 + $0xb0] ss:$28 sps:$4 sm:$0xff]  }
 0x27e   :  { %1540 = vmatpush1.bf16.msra.mxu0 %v3174_v12  ;;  %v3221_v12 = vld [vmem:[#allocation13 + $0x7c] ss:$28 sps:$4 sm:$0xff]  }
 0x27f   :  { %1541 = vmatprep.subr.bf16.mxu0 %v3179_v19  ;;  %v3219_v19 = vld [vmem:[#allocation13 + $0x78] ss:$28 sps:$4 sm:$0xff]  }
 0x282   :  { %1542 = vmatpush1.bf16.msra.mxu0 %v3177_v20  ;;  %v3227_v20 = vld [vmem:[#allocation13 + $0x44] ss:$28 sps:$4 sm:$0xff]  }
 0x283   :  { %1543 = vmatprep.subr.bf16.mxu0 %v3182_v21  ;;  %v3225_v21 = vld [vmem:[#allocation13 + $0x40] ss:$28 sps:$4 sm:$0xff]  }
 0x286   :  { %1544 = vmatpush1.bf16.msra.mxu0 %v3180_v22  ;;  %v3233_v22 = vld [vmem:[#allocation13 + $0xc] ss:$28 sps:$4 sm:$0xff]  }
 0x287   :  { %1545 = vmatprep.subr.bf16.mxu0 %v3185_v33  ;;  %v3255_v33 = vld [vmem:[#allocation13 + $0x2a8] ss:$28 sps:$4 sm:$0xff]  }
 0x28a   :  { %1546 = vmatpush1.bf16.msra.mxu0 %v3183_v35  ;;  %v3263_v35 = vld [vmem:[#allocation13 + $0x274] ss:$28 sps:$4 sm:$0xff]  }
 0x28b   :  { %2358 = vmatprep.subr.bf16.mxu0 %v3191_v38  ;;  %v3267_v38 = vld [vmem:[#allocation13 + $0x238] ss:$28 sps:$4 sm:$0xff]  }
 0x32d   :  { %v1302_v24 = vpop.f32.mrf.mxu0 }
 0x32e   :  { %v1303_v25 = vadd.f32 %v2683_v23, %v1302_v24  ;;  %v3231_v23 = vld [vmem:[#allocation13 + $0x8] ss:$28 sps:$4 sm:$0xff]   ;;  %v3239_v24 = vld [vmem:[#allocation13 + $0x354] ss:$28 sps:$4 sm:$0xff]  }
 0x32f   :  { %v2916_v26 = vpop.f32.mrf.mxu0 }
 0x330   :  { %v1308_v27 = vmax.f32 %v1303_v25, 0.0  ;;  %v3237_v25 = vld [vmem:[#allocation13 + $0x350] ss:$28 sps:$4 sm:$0xff]   ;;  %v3245_v26 = vld [vmem:[#allocation13 + $0x31c] ss:$28 sps:$4 sm:$0xff]  }
 0x331   :  { %v1305_v28 = vpop.f32.mrf.mxu0 }
 0x332   :  { %v1309_v29 = vpack.c.bf16 %v1308_v27, %v1308_v27  ;;  %v3243_v27 = vld [vmem:[#allocation13 + $0x318] ss:$28 sps:$4 sm:$0xff]   ;;  %v3251_v28 = vld [vmem:[#allocation13 + $0x2e4] ss:$28 sps:$4 sm:$0xff]  }
 0x333   :  { %v2917_v30 = vpop.f32.mrf.mxu0 }
 0x334   :  { %2935 = vmatmul.mubr.bf16.vlgmr.msra.gmra.mxu1 %v1309_v29  ;;  %v3249_v29 = vld [vmem:[#allocation13 + $0x2e0] ss:$28 sps:$4 sm:$0xff]   ;;  %v3257_v30 = vld [vmem:[#allocation13 + $0x2ac] ss:$28 sps:$4 sm:$0xff]  }
 0x335   :  { %2318 = vmatpush1.bf16.msra.mxu1 %v3186_v36  ;;  %v3261_v36 = vld [vmem:[#allocation13 + $0x270] ss:$28 sps:$4 sm:$0xff]  }
 0x336   :  { %2319 = vmatprep.subr.bf16.mxu1 %v3194_v39  ;;  %v3272_v39 = vld [vmem:[#allocation13 + $0x1fc] ss:$28 sps:$4 sm:$0xff]  }
 0x339   :  { %2320 = vmatpush1.bf16.msra.mxu1 %v3192_v40  ;;  %v3275_v40 = vld [vmem:[#allocation13 + $0x204] ss:$28 sps:$4 sm:$0xff]  }
 0x33a   :  { %2321 = vmatprep.subr.bf16.mxu1 %v3200_v41  ;;  %v3270_v41 = vld [vmem:[#allocation13 + $0x1f8] ss:$28 sps:$4 sm:$0xff]  }
 0x33d   :  { %2322 = vmatpush1.bf16.msra.mxu1 %v3198_v42  ;;  %v3273_v42 = vld [vmem:[#allocation13 + $0x200] ss:$28 sps:$4 sm:$0xff]  }
 0x33e   :  { %2323 = vmatprep.subr.bf16.mxu1 %v3206_v43  ;;  %v3278_v43 = vld [vmem:[#allocation13 + $0x1c4] ss:$28 sps:$4 sm:$0xff]  }
 0x341   :  { %2324 = vmatpush1.bf16.msra.mxu1 %v3204_v44  ;;  %v3281_v44 = vld [vmem:[#allocation13 + $0x1cc] ss:$28 sps:$4 sm:$0xff]  }
 0x342   :  { %2325 = vmatprep.subr.bf16.mxu1 %v3212_v45  ;;  %v3276_v45 = vld [vmem:[#allocation13 + $0x1c0] ss:$28 sps:$4 sm:$0xff]  }
 0x345   :  { %2326 = vmatpush1.bf16.msra.mxu1 %v3210_v46  ;;  %v3279_v46 = vld [vmem:[#allocation13 + $0x1c8] ss:$28 sps:$4 sm:$0xff]  }
 0x346   :  { %2327 = vmatprep.subr.bf16.mxu1 %v3218_v47  ;;  %v3284_v47 = vld [vmem:[#allocation13 + $0x19c] ss:$28 sps:$4 sm:$0xff]  }
 0x349   :  { %2328 = vmatpush1.bf16.msra.mxu1 %v3216_v48  ;;  %v3285_v48 = vld [vmem:[#allocation13 + $0x360] ss:$28 sps:$4 sm:$0xff]  }
 0x34a   :  { %2329 = vmatprep.subr.bf16.mxu1 %v3224_v49  ;;  %v1439_v49 = vld [vmem:[%s3743_s10] sm:$0x3] }
 0x34d   :  { %2330 = vmatpush1.bf16.msra.mxu1 %v3222_v50  ;;  %v1444_v50 = vrot.slane %v1439_v49, %v3678_v32 }
 0x34e   :  { %2331 = vmatprep.subr.bf16.mxu1 %v3230_v51  ;;  %v1448_v51 = vrot.slane %v1439_v49, %v3684_v34  ;;  %v1720_v49 = vsub.s32 3, %v3675_v31 }
 0x351   :  { %2332 = vmatpush1.bf16.msra.mxu1 %v3228_v52 }
 0x352   :  { %2333 = vmatprep.subr.bf16.mxu1 %v3236_v53 }
 0x355   :  { %2334 = vmatpush2.bf16.msra.mxu1 %v3234_v54 }
 0x356   :  { %2335 = vmatprep.subr.bf16.mxu1 %v3242_v55 }
 0x359   :  { %2336 = vmatpush2.bf16.msra.mxu1 %v3240_v56 }
 0x35a   :  { %2337 = vmatprep.subr.bf16.mxu1 %v3248_v57 }
 0x35d   :  { %2338 = vmatpush2.bf16.msra.mxu1 %v3246_v58 }
 0x35e   :  { %2339 = vmatprep.subr.bf16.mxu1 %v3254_v59 }
 0x361   :  { %2340 = vmatpush2.bf16.msra.mxu1 %v3252_v60 }
 0x362   :  { %2341 = vmatprep.subr.bf16.mxu1 %v3260_v61  ;;  %v3282_v61 = vld [vmem:[#allocation13 + $0x198] ss:$28 sps:$4 sm:$0xff]  }
 0x365   :  { %2342 = vmatpush2.bf16.msra.mxu1 %v3258_v62  ;;  %v3286_v62 = vld [vmem:[#allocation13 + $0x1a0] ss:$28 sps:$4 sm:$0xff]  }
 0x366   :  { %2343 = vmatprep.subr.bf16.mxu1 %v3266_v63 }
 0x369   :  { %2344 = vmatpush2.bf16.msra.mxu1 %v3264_v0  ;;  %v3289_v0 = vld [vmem:[#allocation13 + $0x164] ss:$28 sps:$4 sm:$0xff]  }
 0x36a   :  { %2345 = vmatprep.subr.bf16.mxu1 %v3272_v39  ;;  %v3336_v39 = vld [vmem:[#allocation13 + $0x27c] ss:$28 sps:$4 sm:$0xff]  }
 0x36d   :  { %2346 = vmatpush2.bf16.msra.mxu1 %v3270_v41  ;;  %v3339_v41 = vld [vmem:[#allocation13 + $0x244] ss:$28 sps:$4 sm:$0xff]  }
 0x36e   :  { %2347 = vmatprep.subr.bf16.mxu1 %v3278_v43  ;;  %v3342_v43 = vld [vmem:[#allocation13 + $0x20c] ss:$28 sps:$4 sm:$0xff]  }
 0x371   :  { %2348 = vmatpush2.bf16.msra.mxu1 %v3276_v45  ;;  %v3345_v45 = vld [vmem:[#allocation13 + $0x1d4] ss:$28 sps:$4 sm:$0xff]  }
 0x372   :  { %2399 = vmatprep.subr.bf16.mxu1 %v3284_v47  ;;  %v1716_v47 = vsub.s32 2, %v3675_v31 }
 0x3f4   :  { %v1415_v2 = vpop.f32.mrf.mxu1 }
 0x3f5   :  { %v1416_v3 = vadd.f32 %v2692_v1, %v1415_v2  ;;  %v3290_v1 = vld [vmem:[#allocation13 + $0x328] ss:$28 sps:$4 sm:$0xff]   ;;  %v3287_v2 = vld [vmem:[#allocation13 + $0x160] ss:$28 sps:$4 sm:$0xff]  }
 0x3f6   :  { %v2936_v4 = vpop.f32.mrf.mxu1 }
 0x3f7   :  { %v1421_v5 = vmax.f32 %v1416_v3, 0.0  ;;  %v3291_v3 = vld [vmem:[#allocation13 + $0x168] ss:$28 sps:$4 sm:$0xff]  }
 0x3f8   :  { %v1418_v6 = vpop.f32.mrf.mxu1  ;;  %v3294_v4 = vld [vmem:[#allocation13 + $0x12c] ss:$28 sps:$4 sm:$0xff]  }
 0x3f9   :  { %v1422_v8 = vpack.c.bf16 %v1421_v5, %v1421_v5  ;;  %v3295_v5 = vld [vmem:[#allocation13 + $0x2f0] ss:$28 sps:$4 sm:$0xff]   ;;  %v3292_v6 = vld [vmem:[#allocation13 + $0x128] ss:$28 sps:$4 sm:$0xff]  }
 0x3fa   :  { %v2937_v10 = vpop.f32.mrf.mxu1 }
 0x3fb   :  { %1564 = vmatmul.mubr.bf16.vlgmr.msra.gmra.mxu0 %v1422_v8  ;;  %v3299_v8 = vld [vmem:[#allocation13 + $0xf4] ss:$28 sps:$4 sm:$0xff]  }
 0x3fc   :  { %2359 = vmatpush1.bf16.msra.mxu0 %v3189_v7  ;;  %v3296_v7 = vld [vmem:[#allocation13 + $0x130] ss:$28 sps:$4 sm:$0xff]  }
 0x3fd   :  { %2360 = vmatprep.subr.bf16.mxu0 %v3197_v9  ;;  %v3300_v9 = vld [vmem:[#allocation13 + $0x2b8] ss:$28 sps:$4 sm:$0xff]   ;;  %v3297_v10 = vld [vmem:[#allocation13 + $0xf0] ss:$28 sps:$4 sm:$0xff]  }
 0x400   :  { %2361 = vmatpush1.bf16.msra.mxu0 %v3195_v11  ;;  %v3301_v11 = vld [vmem:[#allocation13 + $0xf8] ss:$28 sps:$4 sm:$0xff]  }
 0x401   :  { %2362 = vmatprep.subr.bf16.mxu0 %v3203_v13  ;;  %v3304_v13 = vld [vmem:[#allocation13 + $0xbc] ss:$28 sps:$4 sm:$0xff]  }
 0x404   :  { %2363 = vmatpush1.bf16.msra.mxu0 %v3201_v14  ;;  %v3305_v14 = vld [vmem:[#allocation13 + $0x280] ss:$28 sps:$4 sm:$0xff]  }
 0x405   :  { %2364 = vmatprep.subr.bf16.mxu0 %v3209_v16  ;;  %v3302_v16 = vld [vmem:[#allocation13 + $0xb8] ss:$28 sps:$4 sm:$0xff]  }
 0x408   :  { %2365 = vmatpush1.bf16.msra.mxu0 %v3207_v17  ;;  %v3306_v17 = vld [vmem:[#allocation13 + $0xc0] ss:$28 sps:$4 sm:$0xff]  }
 0x409   :  { %2366 = vmatprep.subr.bf16.mxu0 %v3215_v15  ;;  %v3309_v15 = vld [vmem:[#allocation13 + $0x84] ss:$28 sps:$4 sm:$0xff]  }
 0x40c   :  { %2367 = vmatpush1.bf16.msra.mxu0 %v3213_v18  ;;  %v3310_v18 = vld [vmem:[#allocation13 + $0x248] ss:$28 sps:$4 sm:$0xff]  }
 0x40d   :  { %2368 = vmatprep.subr.bf16.mxu0 %v3221_v12  ;;  %v3307_v12 = vld [vmem:[#allocation13 + $0x80] ss:$28 sps:$4 sm:$0xff]  }
 0x410   :  { %2369 = vmatpush1.bf16.msra.mxu0 %v3219_v19  ;;  %v3311_v19 = vld [vmem:[#allocation13 + $0x88] ss:$28 sps:$4 sm:$0xff]  }
 0x411   :  { %2370 = vmatprep.subr.bf16.mxu0 %v3227_v20  ;;  %v3314_v20 = vld [vmem:[#allocation13 + $0x4c] ss:$28 sps:$4 sm:$0xff]  }
 0x414   :  { %2371 = vmatpush1.bf16.msra.mxu0 %v3225_v21  ;;  %v3315_v21 = vld [vmem:[#allocation13 + $0x210] ss:$28 sps:$4 sm:$0xff]  }
 0x415   :  { %2372 = vmatprep.subr.bf16.mxu0 %v3233_v22  ;;  %v3312_v22 = vld [vmem:[#allocation13 + $0x48] ss:$28 sps:$4 sm:$0xff]  }
 0x418   :  { %2373 = vmatpush1.bf16.msra.mxu0 %v3231_v23  ;;  %v3316_v23 = vld [vmem:[#allocation13 + $0x50] ss:$28 sps:$4 sm:$0xff]  }
 0x419   :  { %2374 = vmatprep.subr.bf16.mxu0 %v3239_v24  ;;  %v3319_v24 = vld [vmem:[#allocation13 + $0x14] ss:$28 sps:$4 sm:$0xff]  }
 0x41c   :  { %2375 = vmatpush2.bf16.msra.mxu0 %v3237_v25  ;;  %v3320_v25 = vld [vmem:[#allocation13 + $0x1d8] ss:$28 sps:$4 sm:$0xff]  }
 0x41d   :  { %2376 = vmatprep.subr.bf16.mxu0 %v3245_v26  ;;  %v3317_v26 = vld [vmem:[#allocation13 + $0x10] ss:$28 sps:$4 sm:$0xff]  }
 0x420   :  { %2377 = vmatpush2.bf16.msra.mxu0 %v3243_v27  ;;  %v3321_v27 = vld [vmem:[#allocation13 + $0x18] ss:$28 sps:$4 sm:$0xff]  }
 0x421   :  { %2378 = vmatprep.subr.bf16.mxu0 %v3251_v28  ;;  %v3324_v28 = vld [vmem:[#allocation13 + $0x35c] ss:$28 sps:$4 sm:$0xff]  }
 0x424   :  { %2379 = vmatpush2.bf16.msra.mxu0 %v3249_v29  ;;  %v3322_v29 = vld [vmem:[#allocation13 + $0x358] ss:$28 sps:$4 sm:$0xff]  }
 0x425   :  { %2380 = vmatprep.subr.bf16.mxu0 %v3257_v30  ;;  %v3327_v30 = vld [vmem:[#allocation13 + $0x324] ss:$28 sps:$4 sm:$0xff]  }
 0x428   :  { %2381 = vmatpush2.bf16.msra.mxu0 %v3255_v33  ;;  %v3325_v33 = vld [vmem:[#allocation13 + $0x320] ss:$28 sps:$4 sm:$0xff]  }
 0x429   :  { %2382 = vmatprep.subr.bf16.mxu0 %v3263_v35  ;;  %v3330_v35 = vld [vmem:[#allocation13 + $0x2ec] ss:$28 sps:$4 sm:$0xff]  }
 0x42c   :  { %2383 = vmatpush2.bf16.msra.mxu0 %v3261_v36  ;;  %v3328_v36 = vld [vmem:[#allocation13 + $0x2e8] ss:$28 sps:$4 sm:$0xff]  }
 0x42d   :  { %2384 = vmatprep.subr.bf16.mxu0 %v3269_v37  ;;  %v3333_v37 = vld [vmem:[#allocation13 + $0x2b4] ss:$28 sps:$4 sm:$0xff]  }
 0x430   :  { %2385 = vmatpush2.bf16.msra.mxu0 %v3267_v38  ;;  %v3331_v38 = vld [vmem:[#allocation13 + $0x2b0] ss:$28 sps:$4 sm:$0xff]  }
 0x431   :  { %2386 = vmatprep.subr.bf16.mxu0 %v3275_v40  ;;  %v3334_v40 = vld [vmem:[#allocation13 + $0x278] ss:$28 sps:$4 sm:$0xff]  }
 0x434   :  { %2387 = vmatpush2.bf16.msra.mxu0 %v3273_v42  ;;  %v3337_v42 = vld [vmem:[#allocation13 + $0x240] ss:$28 sps:$4 sm:$0xff]  }
 0x435   :  { %2388 = vmatprep.subr.bf16.mxu0 %v3281_v44  ;;  %v3340_v44 = vld [vmem:[#allocation13 + $0x208] ss:$28 sps:$4 sm:$0xff]  }
 0x438   :  { %2389 = vmatpush2.bf16.msra.mxu0 %v3279_v46  ;;  %v3343_v46 = vld [vmem:[#allocation13 + $0x1d0] ss:$28 sps:$4 sm:$0xff]  }
 0x439   :  { %2876 = vmatprep.subr.bf16.mxu0 %v3285_v48  ;;  %v1704_v48 = vld [vmem:[%s3745_s12] sm:$0xff]  ;;  %s3560_s12 = smov [#allocation14]  }
 0x43a   :  { %s2535_s5 = sshll.u32 %s3560_s12, 4  ;;  %s2536_s5 = int_to_ptr.vmem [resolvable:$true] %s2535_s5 }
 0x43b   :  { %s3514_s16 = scalar_lea.vmem %s2536_s5, 896  ;;  %p3519_p8 = scmp.lt.s32.totalorder %s2536_s5, %s2536_s5 }
 0x43c   :  { %p3515_p7 = scmp.ne.s32.totalorder %s2536_s5, %s3514_s16  ;;  %p3520_p9 = scmp.lt.s32.totalorder %s3514_s16, %s3514_s16 }
 0x43e   :  { %p3521_p10 = por %p3520_p9, %p3519_p8 }
 0x440   :  { %p3522_p11 = pnand %p3521_p10, %p3515_p7 }
 0x4bb   :  { %v1565_v52 = vpop.f32.mrf.mxu0 }
 0x4bc   :  { %v1566_v53 = vadd.f32 %v1565_v52, %v1444_v50  ;;  %v1709_v50 = vrot.slane %v1704_v48, %v3678_v32  ;;  %v1713_v52 = vrot.slane %v1704_v48, %v3684_v34 }
 0x4bd   :  { %v1567_v54 = vpop.f32.mrf.mxu0 }
 0x4be   :  { %v1568_v55 = vadd.f32 %v1567_v54, %v1448_v51  ;;  %v1572_v56 = vmax.f32 %v1566_v53, 0.0  ;;  %v1717_v51 = vrot.slane %v1704_v48, %v1716_v47  ;;  %v1721_v53 = vrot.slane %v1704_v48, %v1720_v49 }
 0x4bf   :  { %v1569_v57 = vpop.f32.mrf.mxu0 }
 0x4c0   :  { %v1573_v58 = vmax.f32 %v1568_v55, 0.0  ;;  %v3714_v63 = vpack.c.bf16 %v1572_v56, %v1572_v56 }
 0x4c1   :  { %v1570_v59 = vpop.f32.mrf.mxu0 }
 0x4c2   :  { %v1575_v60 = vpack.c.bf16 %v1573_v58, %v1573_v58 }
 0x4c4   :  { %2349 = vmatprep.mubr.bf16.mxu1 %v1575_v60  ;;  %2390 = vmatprep.mubr.bf16.mxu0 %v1575_v60 }
 0x4c5   :  { %2350 = vmatmul.mubr.bf16.vlgmr.msra.gmra.mxu1 %v3714_v63  ;;  %2391 = vmatmul.mubr.bf16.vlgmr.msra.gmra.mxu0 %v3714_v63 }
 0x4c6   :  { %2400 = vmatpush1.bf16.msra.mxu1 %v3282_v61  ;;  %2877 = vmatpush3.bf16.msra.mxu0 %v3286_v62 }
 0x4c7   :  { %2431 = vmatprep.mubr.bf16.mxu1 %v1575_v60  ;;  %2472 = vmatprep.mubr.bf16.mxu0 %v1575_v60 }
 0x4c8   :  { %2401 = vmatprep.subr.bf16.mxu1 %v3289_v0  ;;  %2878 = vmatprep.subr.bf16.mxu0 %v3290_v1 }
 0x4ca   :  { %2402 = vmatpush1.bf16.msra.mxu1 %v3287_v2  ;;  %2879 = vmatpush3.bf16.msra.mxu0 %v3291_v3 }
 0x4cb   :  { %2403 = vmatprep.subr.bf16.mxu1 %v3294_v4  ;;  %2880 = vmatprep.subr.bf16.mxu0 %v3295_v5 }
 0x4ce   :  { %2404 = vmatpush1.bf16.msra.mxu1 %v3292_v6  ;;  %2881 = vmatpush3.bf16.msra.mxu0 %v3296_v7 }
 0x4cf   :  { %2405 = vmatprep.subr.bf16.mxu1 %v3299_v8  ;;  %2882 = vmatprep.subr.bf16.mxu0 %v3300_v9 }
 0x4d2   :  { %2406 = vmatpush1.bf16.msra.mxu1 %v3297_v10  ;;  %2883 = vmatpush3.bf16.msra.mxu0 %v3301_v11 }
 0x4d3   :  { %2407 = vmatprep.subr.bf16.mxu1 %v3304_v13  ;;  %2884 = vmatprep.subr.bf16.mxu0 %v3305_v14  ;;  %v1732_v13 = vsub.s32 6, %v3675_v31 }
 0x4d6   :  { %2408 = vmatpush1.bf16.msra.mxu1 %v3302_v16  ;;  %2885 = vmatpush3.bf16.msra.mxu0 %v3306_v17  ;;  %v1733_v16 = vrot.slane %v1704_v48, %v1732_v13 }
 0x4d7   :  { %2409 = vmatprep.subr.bf16.mxu1 %v3309_v15  ;;  %2886 = vmatprep.subr.bf16.mxu0 %v3310_v18 }
 0x4da   :  { %2410 = vmatpush1.bf16.msra.mxu1 %v3307_v12  ;;  %2887 = vmatpush3.bf16.msra.mxu0 %v3311_v19 }
 0x4db   :  { %2411 = vmatprep.subr.bf16.mxu1 %v3314_v20  ;;  %2888 = vmatprep.subr.bf16.mxu0 %v3315_v21 }
 0x4de   :  { %2412 = vmatpush1.bf16.msra.mxu1 %v3312_v22  ;;  %2889 = vmatpush3.bf16.msra.mxu0 %v3316_v23 }
 0x4df   :  { %2413 = vmatprep.subr.bf16.mxu1 %v3319_v24  ;;  %2890 = vmatprep.subr.bf16.mxu0 %v3320_v25 }
 0x4e2   :  { %2414 = vmatpush1.bf16.msra.mxu1 %v3317_v26  ;;  %2891 = vmatpush3.bf16.msra.mxu0 %v3321_v27  ;;  %v1724_v27 = vsub.s32 4, %v3675_v31 }
 0x4e3   :  { %2415 = vmatprep.subr.bf16.mxu1 %v3324_v28  ;;  %v1728_v28 = vsub.s32 5, %v3675_v31 }
 0x4e5   :  { %2473 = vmatmul.mubr.bf16.vlgmr.msra.gmra.mxu0 %v3714_v63 }
 0x4e6   :  { %2416 = vmatpush2.bf16.msra.mxu1 %v3322_v29  ;;  %v1725_v29 = vrot.slane %v1704_v48, %v1724_v27 }
 0x4e7   :  { %2417 = vmatprep.subr.bf16.mxu1 %v3327_v30  ;;  %v1729_v30 = vrot.slane %v1704_v48, %v1728_v28 }
 0x4ea   :  { %2418 = vmatpush2.bf16.msra.mxu1 %v3325_v33 }
 0x4eb   :  { %2419 = vmatprep.subr.bf16.mxu1 %v3330_v35 }
 0x4ee   :  { %2420 = vmatpush2.bf16.msra.mxu1 %v3328_v36 }
 0x4ef   :  { %2421 = vmatprep.subr.bf16.mxu1 %v3333_v37 }
 0x4f2   :  { %2422 = vmatpush2.bf16.msra.mxu1 %v3331_v38 }
 0x4f3   :  { %2423 = vmatprep.subr.bf16.mxu1 %v3336_v39 }
 0x4f6   :  { %2424 = vmatpush2.bf16.msra.mxu1 %v3334_v40 }
 0x4f7   :  { %2425 = vmatprep.subr.bf16.mxu1 %v3339_v41 }
 0x4fa   :  { %2426 = vmatpush2.bf16.msra.mxu1 %v3337_v42 }
 0x4fb   :  { %2427 = vmatprep.subr.bf16.mxu1 %v3342_v43 }
 0x4fe   :  { %2428 = vmatpush2.bf16.msra.mxu1 %v3340_v44 }
 0x4ff   :  { %2429 = vmatprep.subr.bf16.mxu1 %v3345_v45 }
 0x502   :  { %2430 = vmatpush2.bf16.msra.mxu1 %v3343_v46 }
 0x505   :  { %2432 = vmatmul.mubr.bf16.vlgmr.msra.gmra.mxu1 %v3714_v63 }
 0x585   :  { %v2351_v54 = vpop.f32.mrf.mxu1  ;;  %v2392_v55 = vpop.f32.mrf.mxu0 }
 0x586   :  { %v2352_v56 = vadd.f32 %v2351_v54, %v1709_v50  ;;  %v2393_v57 = vadd.f32 %v2392_v55, %v1717_v51 }
 0x587   :  { %v2353_v58 = vpop.f32.mrf.mxu1  ;;  %v2394_v59 = vpop.f32.mrf.mxu0 }
 0x588   :  { %v2829_v60 = vmul.f32 -1.442695, %v2352_v56  ;;  %v2831_v61 = vmul.f32 -1.442695, %v2393_v57  ;;  %v2354_v62 = vadd.f32 %v2353_v58, %v1713_v52  ;;  %v2395_v63 = vadd.f32 %v2394_v59, %v1721_v53 }
 0x589   :  { %v2355_v0 = vpop.f32.mrf.mxu1  ;;  %v2396_v1 = vpop.f32.mrf.mxu0 }
 0x58a   :  { %3346 = vpow2.f32 %v2829_v60  ;;  %v2830_v2 = vmul.f32 -1.442695, %v2354_v62  ;;  %v2832_v3 = vmul.f32 -1.442695, %v2395_v63 }
 0x58b   :  { %3348 = vpow2.f32 %v2831_v61  ;;  %v2356_v32 = vpop.f32.mrf.mxu1  ;;  %v2397_v4 = vpop.f32.mrf.mxu0 }
 0x58c   :  { %3350 = vpow2.f32 %v2830_v2 }
 0x58d   :  { %3352 = vpow2.f32 %v2832_v3 }
 0x597   :  { %v3347_v34 = vpop.eup %3346 }
 0x598   :  { %v3349_v5 = vpop.eup %3348  ;;  %v2501_v6 = vadd.f32 1.0, %v3347_v34 }
 0x599   :  { %v3351_v7 = vpop.eup %3350  ;;  %v2503_v8 = vadd.f32 1.0, %v3349_v5 }
 0x59a   :  { %v3353_v9 = vpop.eup %3352  ;;  %3354 = vrcp.f32 %v2501_v6  ;;  %v2502_v10 = vadd.f32 1.0, %v3351_v7 }
 0x59b   :  { %3356 = vrcp.f32 %v2503_v8  ;;  %v2504_v11 = vadd.f32 1.0, %v3353_v9 }
 0x59c   :  { %3358 = vrcp.f32 %v2502_v10 }
 0x59d   :  { %3360 = vrcp.f32 %v2504_v11 }
 0x5a5   :  { %v2892_v14 = vpop.f32.mrf.mxu0 }
 0x5a7   :  { %v3355_v17 = vpop.eup %3354  ;;  %v2893_v15 = vpop.f32.mrf.mxu0 }
 0x5a8   :  { %v3357_v18 = vpop.eup %3356  ;;  %2522 = vst [vmem:[#allocation14] sm:$0xff] %v3355_v17  ;;  %v2894_v12 = vadd.f32 %v2893_v15, %v2892_v14 }
 0x5a9   :  { %v3359_v19 = vpop.eup %3358  ;;  %2524 = vst [vmem:[#allocation14 + $0x10] sm:$0xff] %v3357_v18  ;;  %v2895_v20 = vpop.f32.mrf.mxu0 }
 0x5aa   :  { %v3361_v21 = vpop.eup %3360  ;;  %2523 = vst [vmem:[#allocation14 + $0x8] sm:$0xff] %v3359_v19  ;;  %v2475_v22 = vadd.f32 %v2894_v12, %v1733_v16 }
 0x5ab   :  { %2525 = vst [vmem:[#allocation14 + $0x18] sm:$0xff] %v3361_v21  ;;  %v2896_v23 = vpop.f32.mrf.mxu0 }
 0x5ac   :  { %v2835_v24 = vmul.f32 -1.442695, %v2475_v22 }
 0x5ae   :  { %3362 = vpow2.f32 %v2835_v24 }
 0x5bb   :  { %v3363_v25 = vpop.eup %3362 }
 0x5bc   :  { %v2507_v26 = vadd.f32 1.0, %v3363_v25 }
 0x5be   :  { %3364 = vrcp.f32 %v2507_v26 }
 0x5c5   :  { %v2433_v33 = vpop.f32.mrf.mxu1 }
 0x5c6   :  { %v2434_v35 = vadd.f32 %v2433_v33, %v1725_v29 }
 0x5c7   :  { %v2435_v36 = vpop.f32.mrf.mxu1 }
 0x5c8   :  { %v2833_v37 = vmul.f32 -1.442695, %v2434_v35  ;;  %v2436_v38 = vadd.f32 %v2435_v36, %v1729_v30 }
 0x5c9   :  { %v2437_v39 = vpop.f32.mrf.mxu1 }
 0x5ca   :  { %3366 = vpow2.f32 %v2833_v37  ;;  %v2834_v40 = vmul.f32 -1.442695, %v2436_v38 }
 0x5cb   :  { %v3365_v41 = vpop.eup %3364  ;;  %v2438_v42 = vpop.f32.mrf.mxu1 }
 0x5cc   :  { %2528 = vst [vmem:[#allocation14 + $0x30] sm:$0xff] %v3365_v41  ;;  %3368 = vpow2.f32 %v2834_v40 }
 0x5d7   :  { %v3367_v43 = vpop.eup %3366 }
 0x5d8   :  { %v2505_v44 = vadd.f32 1.0, %v3367_v43 }
 0x5d9   :  { %v3369_v45 = vpop.eup %3368 }
 0x5da   :  { %3370 = vrcp.f32 %v2505_v44  ;;  %v2506_v46 = vadd.f32 1.0, %v3369_v45 }
 0x5dc   :  { %3372 = vrcp.f32 %v2506_v46 }
 0x5e7   :  { %v3371_v31 = vpop.eup %3370 }
 0x5e8   :  { %2526 = vst [vmem:[#allocation14 + $0x20] sm:$0xff] %v3371_v31 }
 0x5e9   :  { %v3373_v47 = vpop.eup %3372 }
 0x5ea   :  { %2527 = vst [vmem:[#allocation14 + $0x28] sm:$0xff] %v3373_v47 }
 0x5eb   :  { %3525 = shalt.err (!%p3522_p11)
}
 0x5ec   :  { %2538 = dma.vmem_to_hbm [thread:$0]  %s2536_s5, 896, %s3746_s13, [#allocation4]  }
 0x5ed   :  { %3542 = dma.done.wait [#allocation4], 896  }
 0x5ee   :  { %3543 = vsyncadd [#allocation4], 4294966400 }
 0x5ef   :  { %2542 = vsyncpa [#allocation3], 1 }
 0x5f0   :  { %2543 = vsyncpa [#allocation6], 1 }
 0x5f1   :  { %2544 = vsyncpa [#allocation9], 1 }
 0x5f2   :  { %2545 = vsyncpa [#allocation12], 1 }
 0x5f3   :  { %2546 = vsyncpa [#allocation4], 1 }

</bundles_post_ra>
